<compile_context>
chip_gen: v6e
topology: v6e:2x2x1
jax: 0.10.0
libtpu: 0.0.40
codegen_flags: <defaults>
</compile_context>

<pallas_src>
import functools

import jax
import jax.numpy as jnp
from jax.experimental import pallas as pl
from jax.experimental.pallas import tpu as pltpu


def _lstm_corrector_kernel(num_layers, seq_len, batch, hidden, *refs):
    """refs = inputs, mask, orig, h0, c0, fc_wT, fc_b,
              [w_ihT (in,4H), w_hhT (H,4H), b (1,4H)] * num_layers,
              out, h_n, c_n,
              xp_scratch (T*B,4H), hs_scratch (T*B,H)

    Sequence tensors are time-major flattened: (T*B, C); rows [t*B:(t+1)*B]
    hold timestep t.  Gate order along the fused 4H axis is PyTorch's
    i, f, g, o."""
    B = batch
    H = hidden
    n_fixed = 7
    (in_ref, mask_ref, orig_ref, h0_ref, c0_ref,
     fc_wT_ref, fc_b_ref) = refs[:n_fixed]
    layer_refs = refs[n_fixed:n_fixed + 3 * num_layers]
    n_in = n_fixed + 3 * num_layers
    out_ref, hn_ref, cn_ref = refs[n_in:n_in + 3]
    xp_s, hs_s = refs[n_in + 3:n_in + 5]

    inputs = in_ref[...]                            # (T*B, C)
    mask = mask_ref[...]                            # (T*B, C) 0/1 "already intervened"
    # Hoisted invariants, reused in the epilogue mix (no recompute).
    masked_in = mask * inputs                       # (T*B, C)
    inv_mask = 1.0 - mask                           # (T*B, C)
    # input_format == 'original_and_intervened_inplace'
    x_seq = masked_in + inv_mask * orig_ref[...]    # (T*B, C)

    # fc weights hoisted once.
    fc_wT = fc_wT_ref[...]                          # (H, C_out)
    fc_b = fc_b_ref[...]                            # (1, C_out)

    seq = x_seq                                     # layer input, (T*B, in_dim)
    for l in range(num_layers):
        # Fused, lane-dense (last dim = 4H = 128) weights, hoisted ONCE per
        # layer.  (Optional v6e/v7x win: .astype(jnp.bfloat16) here and on h
        # at the dot boundary, keeping preferred_element_type=f32.)
        w_ihT = layer_refs[3 * l][...]              # (in_dim, 4H)
        w_hhT = layer_refs[3 * l + 1][...]          # (H, 4H)
        b = layer_refs[3 * l + 2][...]              # (1, 4H) == b_ih + b_hh

        # Fused input-to-hidden projection for ALL timesteps of this layer:
        # one batched matmul + one bias add, parked in VMEM scratch so the
        # per-step slices are plain vld's rather than live vregs.
        xp_s[...] = (jnp.dot(seq, w_ihT, preferred_element_type=jnp.float32)
                     + b)

        h = h0_ref[l]                               # (B, H)
        c = c0_ref[l]                               # (B, H)
        # Statically unrolled time loop (T is small here).
        for t in range(seq_len):
            r0 = t * B
            # ONE fused (B, H) @ (H, 4H) matmul on the serial critical path.
            gates = (xp_s[r0:r0 + B, :]
                     + jnp.dot(h, w_hhT, preferred_element_type=jnp.float32))
            # Static lane-slice gate split (i, f, g, o).
            i_g = jax.nn.sigmoid(gates[:, 0:H])
            f_g = jax.nn.sigmoid(gates[:, H:2 * H])
            g_g = jnp.tanh(gates[:, 2 * H:3 * H])
            o_g = jax.nn.sigmoid(gates[:, 3 * H:4 * H])
            c = f_g * c + i_g * g_g
            h = o_g * jnp.tanh(c)
            hs_s[r0:r0 + B, :] = h                  # idle vst slot

        hn_ref[l, :, :] = h
        cn_ref[l, :, :] = c
        seq = hs_s[...]                             # (T*B, H) -> next layer / fc

    # Bulk epilogue: one fc matmul + sigmoid + whole-tensor intervention
    # re-mix + single store.
    y = jax.nn.sigmoid(
        jnp.dot(seq, fc_wT, preferred_element_type=jnp.float32) + fc_b)
    out_ref[...] = masked_in + inv_mask * y


@jax.jit
def lstm_concept_corrector_forward(inputs, already_intervened, original_preds,
                                   hidden, params):
    """Pallas-backed equivalent of LSTMConceptCorrector.forward
    (input_format='original_and_intervened_inplace', batch_first=True).

    Jitted as a whole so the time-major transposes / fc_w.T / output reshape
    fuse with the pallas_call instead of costing separate dispatches."""
    h0, c0 = hidden
    B, T, C = inputs.shape
    L, _, H = h0.shape
    fc_w, fc_b = params["fc"]
    out_size = fc_w.shape[0]
    # The re-mix multiplies the (B,T,C) mask with the fc output; this module
    # always has output_size == input concept count.
    assert out_size == C, "fc output size must match concept input size"

    def to_time_major_2d(x):
        # (B, T, C) -> (T, B, C) -> (T*B, C): each timestep is a contiguous
        # row block, so the kernel's time loop uses static row slices.
        return jnp.transpose(x, (1, 0, 2)).reshape(T * B, x.shape[-1])

    layer_args = []
    for l in range(L):
        w_ih, w_hh, b_ih, b_hh = params["layers"][l]
        # Fused, lane-dense layouts: columns are the 4H gate axis (i,f,g,o).
        layer_args += [
            w_ih.T,                        # (in_dim, 4H)
            w_hh.T,                        # (H, 4H)
            (b_ih + b_hh)[None, :],        # (1, 4H)
        ]

    vmem = pl.BlockSpec(memory_space=pltpu.MemorySpace.VMEM)
    n_in = 7 + 3 * L
    kernel = functools.partial(_lstm_corrector_kernel, L, T, B, H)

    out_flat, h_n, c_n = pl.pallas_call(
        kernel,
        out_shape=(jax.ShapeDtypeStruct((T * B, out_size), jnp.float32),
                   jax.ShapeDtypeStruct((L, B, H), jnp.float32),
                   jax.ShapeDtypeStruct((L, B, H), jnp.float32)),
        in_specs=[vmem] * n_in,
        out_specs=(vmem, vmem, vmem),
        scratch_shapes=[
            pltpu.VMEM((T * B, 4 * H), jnp.float32),   # fused input projection
            pltpu.VMEM((T * B, H), jnp.float32),       # per-layer hidden states
        ],
        # Explicit VMEM budget so the no-grid design is also safe on v7x
        # (64 MiB physical / 32 MiB scoped default); usage here is ~100s of KiB.
        # TODO(synk): if batch scales, add a leading "parallel" grid axis over
        # batch tiles to use v7x's second TensorCore.
        compiler_params=pltpu.CompilerParams(vmem_limit_bytes=32 * 1024 * 1024),
    )(to_time_major_2d(inputs), to_time_major_2d(already_intervened),
      to_time_major_2d(original_preds), h0, c0,
      fc_w.T, fc_b[None, :], *layer_args)

    out = out_flat.reshape(T, B, out_size).transpose(1, 0, 2)   # back to (B, T, C)
    return out, (h_n, c_n)


def _ref_forward(inputs, mask, orig, hidden, params):
    """Pure-JAX reference (mirrors nn.LSTM + fc + sigmoid + in-place mixing)."""
    h0, c0 = hidden
    L, _, H = h0.shape
    x = mask * inputs + (1.0 - mask) * orig
    h = [h0[l] for l in range(L)]
    c = [c0[l] for l in range(L)]
    outs = []
    for t in range(x.shape[1]):
        xt = x[:, t, :]
        for l in range(L):
            w_ih, w_hh, b_ih, b_hh = params["layers"][l]
            g = xt @ w_ih.T + h[l] @ w_hh.T + b_ih + b_hh
            i_g = jax.nn.sigmoid(g[:, :H])
            f_g = jax.nn.sigmoid(g[:, H:2 * H])
            g_g = jnp.tanh(g[:, 2 * H:3 * H])
            o_g = jax.nn.sigmoid(g[:, 3 * H:])
            c[l] = f_g * c[l] + i_g * g_g
            h[l] = o_g * jnp.tanh(c[l])
            xt = h[l]
        outs.append(xt)
    lstm_out = jnp.stack(outs, axis=1)
    fc_w, fc_b = params["fc"]
    y = jax.nn.sigmoid(lstm_out @ fc_w.T + fc_b)
    out = mask * inputs + (1.0 - mask) * y
    return out, (jnp.stack(h), jnp.stack(c))


if __name__ == "__main__":
    # Small shapes consistent with the module: concepts=16, hidden=32, 2 layers.
    B, T = 2, 8
    input_size = output_size = 16
    hidden_size = 32
    num_layers = 2

    key = jax.random.PRNGKey(0)
    keys = iter(jax.random.split(key, 4 * num_layers + 8))
    k = 1.0 / jnp.sqrt(hidden_size)

    # Deterministic parameter init (PyTorch-style U(-1/sqrt(H), 1/sqrt(H))).
    layers = []
    for l in range(num_layers):
        in_dim = input_size if l == 0 else hidden_size
        w_ih = jax.random.uniform(next(keys), (4 * hidden_size, in_dim),
                                  jnp.float32, -k, k)
        w_hh = jax.random.uniform(next(keys), (4 * hidden_size, hidden_size),
                                  jnp.float32, -k, k)
        b_ih = jax.random.uniform(next(keys), (4 * hidden_size,), jnp.float32, -k, k)
        b_hh = jax.random.uniform(next(keys), (4 * hidden_size,), jnp.float32, -k, k)
        layers.append((w_ih, w_hh, b_ih, b_hh))
    fc_w = jax.random.uniform(next(keys), (output_size, hidden_size),
                              jnp.float32, -k, k)
    fc_b = jax.random.uniform(next(keys), (output_size,), jnp.float32, -k, k)
    params = {"layers": layers, "fc": (fc_w, fc_b)}

    # Inputs (concept probabilities), intervention mask, and original predictions.
    inputs = jax.random.uniform(next(keys), (B, T, input_size), jnp.float32)
    already_intervened = jax.random.bernoulli(
        next(keys), 0.3, (B, T, input_size)).astype(jnp.float32)
    original_preds = jax.random.uniform(next(keys), (B, T, input_size), jnp.float32)

    # prepare_initial_hidden
    h0 = jnp.zeros((num_layers, B, hidden_size), jnp.float32)
    c0 = jnp.zeros((num_layers, B, hidden_size), jnp.float32)

    out, (h_n, c_n) = lstm_concept_corrector_forward(
        inputs, already_intervened, original_preds, (h0, c0), params)
    jax.block_until_ready((out, h_n, c_n))

    ref_out, (ref_h, ref_c) = _ref_forward(
        inputs, already_intervened, original_preds, (h0, c0), params)
    assert jnp.allclose(out, ref_out, atol=1e-4), "output mismatch"
    assert jnp.allclose(h_n, ref_h, atol=1e-4), "h_n mismatch"
    assert jnp.allclose(c_n, ref_c, atol=1e-4), "c_n mismatch"

    print("KERNEL_OK")
</pallas_src>

<mosaic_0001>
module attributes {stable_mosaic.version = 11 : i64} {
  func.func @_lstm_corrector_kernel(%arg0: memref<16x16xf32, #tpu.memory_space<vmem>>, %arg1: memref<16x16xf32, #tpu.memory_space<vmem>>, %arg2: memref<16x16xf32, #tpu.memory_space<vmem>>, %arg3: memref<2x2x32xf32, #tpu.memory_space<vmem>>, %arg4: memref<2x2x32xf32, #tpu.memory_space<vmem>>, %arg5: memref<32x16xf32, #tpu.memory_space<vmem>>, %arg6: memref<1x16xf32, #tpu.memory_space<vmem>>, %arg7: memref<16x128xf32, #tpu.memory_space<vmem>>, %arg8: memref<32x128xf32, #tpu.memory_space<vmem>>, %arg9: memref<1x128xf32, #tpu.memory_space<vmem>>, %arg10: memref<32x128xf32, #tpu.memory_space<vmem>>, %arg11: memref<32x128xf32, #tpu.memory_space<vmem>>, %arg12: memref<1x128xf32, #tpu.memory_space<vmem>>, %arg13: memref<16x16xf32, #tpu.memory_space<vmem>>, %arg14: memref<2x2x32xf32, #tpu.memory_space<vmem>>, %arg15: memref<2x2x32xf32, #tpu.memory_space<vmem>>, %arg16: memref<16x128xf32, #tpu.memory_space<vmem>>, %arg17: memref<16x32xf32, #tpu.memory_space<vmem>>) attributes {dimension_semantics = [], scalar_prefetch = 0 : i64, scratch_operands = 2 : i64, tpu.core_type = #tpu.core_type<tc>} {
    %c0 = arith.constant 0 : index
    %c0_0 = arith.constant 0 : index
    %0 = vector.load %arg0[%c0, %c0_0] : memref<16x16xf32, #tpu.memory_space<vmem>>, vector<16x16xf32>
    %c0_1 = arith.constant 0 : index
    %c0_2 = arith.constant 0 : index
    %1 = vector.load %arg1[%c0_1, %c0_2] : memref<16x16xf32, #tpu.memory_space<vmem>>, vector<16x16xf32>
    %2 = arith.mulf %1, %0 : vector<16x16xf32>
    %cst = arith.constant 1.000000e+00 : f32
    %3 = vector.broadcast %cst : f32 to vector<16x16xf32>
    %4 = arith.subf %3, %1 : vector<16x16xf32>
    %c0_3 = arith.constant 0 : index
    %c0_4 = arith.constant 0 : index
    %5 = vector.load %arg2[%c0_3, %c0_4] : memref<16x16xf32, #tpu.memory_space<vmem>>, vector<16x16xf32>
    %6 = arith.mulf %4, %5 : vector<16x16xf32>
    %7 = arith.addf %2, %6 : vector<16x16xf32>
    %c0_5 = arith.constant 0 : index
    %c0_6 = arith.constant 0 : index
    %8 = vector.load %arg5[%c0_5, %c0_6] : memref<32x16xf32, #tpu.memory_space<vmem>>, vector<32x16xf32>
    %c0_7 = arith.constant 0 : index
    %c0_8 = arith.constant 0 : index
    %9 = vector.load %arg6[%c0_7, %c0_8] : memref<1x16xf32, #tpu.memory_space<vmem>>, vector<1x16xf32>
    %c0_9 = arith.constant 0 : index
    %c0_10 = arith.constant 0 : index
    %10 = vector.load %arg7[%c0_9, %c0_10] : memref<16x128xf32, #tpu.memory_space<vmem>>, vector<16x128xf32>
    %c0_11 = arith.constant 0 : index
    %c0_12 = arith.constant 0 : index
    %11 = vector.load %arg8[%c0_11, %c0_12] : memref<32x128xf32, #tpu.memory_space<vmem>>, vector<32x128xf32>
    %c0_13 = arith.constant 0 : index
    %c0_14 = arith.constant 0 : index
    %12 = vector.load %arg9[%c0_13, %c0_14] : memref<1x128xf32, #tpu.memory_space<vmem>>, vector<1x128xf32>
    %cst_15 = arith.constant dense<0.000000e+00> : vector<16x128xf32>
    %13 = tpu.matmul %7, %10, %cst_15 {dimension_numbers = #tpu.dot_dimension_numbers<[1], [0], [0], [1], [0, 0, 1, 1], [], []>} : vector<16x16xf32>, vector<16x128xf32>, vector<16x128xf32> -> vector<16x128xf32>
    %14 = vector.broadcast %12 : vector<1x128xf32> to vector<16x128xf32>
    %15 = arith.addf %13, %14 : vector<16x128xf32>
    %c0_16 = arith.constant 0 : index
    %c0_17 = arith.constant 0 : index
    %16 = vector.load %arg16[%c0_16, %c0_17] : memref<16x128xf32, #tpu.memory_space<vmem>>, vector<16x128xf32>
    tpu.vector_store %arg16[%c0_16, %c0_17], %15 {strides = array<i32>} : memref<16x128xf32, #tpu.memory_space<vmem>>, vector<16x128xf32>,
    %c0_18 = arith.constant 0 : index
    %c0_19 = arith.constant 0 : index
    %c0_20 = arith.constant 0 : index
    %17 = vector.load %arg3[%c0_18, %c0_19, %c0_20] : memref<2x2x32xf32, #tpu.memory_space<vmem>>, vector<1x2x32xf32>
    %18 = vector.shape_cast %17 : vector<1x2x32xf32> to vector<2x32xf32>
    %c0_21 = arith.constant 0 : index
    %c0_22 = arith.constant 0 : index
    %c0_23 = arith.constant 0 : index
    %19 = vector.load %arg4[%c0_21, %c0_22, %c0_23] : memref<2x2x32xf32, #tpu.memory_space<vmem>>, vector<1x2x32xf32>
    %20 = vector.shape_cast %19 : vector<1x2x32xf32> to vector<2x32xf32>
    %c0_24 = arith.constant 0 : index
    %c0_25 = arith.constant 0 : index
    %21 = vector.load %arg16[%c0_24, %c0_25] : memref<16x128xf32, #tpu.memory_space<vmem>>, vector<2x128xf32>
    %cst_26 = arith.constant dense<0.000000e+00> : vector<2x128xf32>
    %22 = tpu.matmul %18, %11, %cst_26 {dimension_numbers = #tpu.dot_dimension_numbers<[1], [0], [0], [1], [0, 0, 1, 1], [], []>} : vector<2x32xf32>, vector<32x128xf32>, vector<2x128xf32> -> vector<2x128xf32>
    %23 = arith.addf %21, %22 : vector<2x128xf32>
    %24 = vector.extract_strided_slice %23 {offsets = [0, 0], sizes = [2, 32], strides = [1, 1]} : vector<2x128xf32> to vector<2x32xf32>
    %25 = arith.negf %24 : vector<2x32xf32>
    %26 = math.exp %25 : vector<2x32xf32>
    %cst_27 = arith.constant 1.000000e+00 : f32
    %27 = vector.broadcast %cst_27 : f32 to vector<2x32xf32>
    %28 = arith.addf %27, %26 : vector<2x32xf32>
    %29 = arith.divf %27, %28 : vector<2x32xf32>
    %30 = vector.extract_strided_slice %23 {offsets = [0, 32], sizes = [2, 32], strides = [1, 1]} : vector<2x128xf32> to vector<2x32xf32>
    %31 = arith.negf %30 : vector<2x32xf32>
    %32 = math.exp %31 : vector<2x32xf32>
    %cst_28 = arith.constant 1.000000e+00 : f32
    %33 = vector.broadcast %cst_28 : f32 to vector<2x32xf32>
    %34 = arith.addf %33, %32 : vector<2x32xf32>
    %35 = arith.divf %33, %34 : vector<2x32xf32>
    %36 = vector.extract_strided_slice %23 {offsets = [0, 64], sizes = [2, 32], strides = [1, 1]} : vector<2x128xf32> to vector<2x32xf32>
    %37 = math.tanh %36 : vector<2x32xf32>
    %38 = vector.extract_strided_slice %23 {offsets = [0, 96], sizes = [2, 32], strides = [1, 1]} : vector<2x128xf32> to vector<2x32xf32>
    %39 = arith.negf %38 : vector<2x32xf32>
    %40 = math.exp %39 : vector<2x32xf32>
    %cst_29 = arith.constant 1.000000e+00 : f32
    %41 = vector.broadcast %cst_29 : f32 to vector<2x32xf32>
    %42 = arith.addf %41, %40 : vector<2x32xf32>
    %43 = arith.divf %41, %42 : vector<2x32xf32>
    %44 = arith.mulf %35, %20 : vector<2x32xf32>
    %45 = arith.mulf %29, %37 : vector<2x32xf32>
    %46 = arith.addf %44, %45 : vector<2x32xf32>
    %47 = math.tanh %46 : vector<2x32xf32>
    %48 = arith.mulf %43, %47 : vector<2x32xf32>
    %c0_30 = arith.constant 0 : index
    %c0_31 = arith.constant 0 : index
    %49 = vector.load %arg17[%c0_30, %c0_31] : memref<16x32xf32, #tpu.memory_space<vmem>>, vector<2x32xf32>
    tpu.vector_store %arg17[%c0_30, %c0_31], %48 {strides = array<i32>} : memref<16x32xf32, #tpu.memory_space<vmem>>, vector<2x32xf32>,
    %c2 = arith.constant 2 : index
    %c0_32 = arith.constant 0 : index
    %50 = vector.load %arg16[%c2, %c0_32] : memref<16x128xf32, #tpu.memory_space<vmem>>, vector<2x128xf32>
    %cst_33 = arith.constant dense<0.000000e+00> : vector<2x128xf32>
    %51 = tpu.matmul %48, %11, %cst_33 {dimension_numbers = #tpu.dot_dimension_numbers<[1], [0], [0], [1], [0, 0, 1, 1], [], []>} : vector<2x32xf32>, vector<32x128xf32>, vector<2x128xf32> -> vector<2x128xf32>
    %52 = arith.addf %50, %51 : vector<2x128xf32>
    %53 = vector.extract_strided_slice %52 {offsets = [0, 0], sizes = [2, 32], strides = [1, 1]} : vector<2x128xf32> to vector<2x32xf32>
    %54 = arith.negf %53 : vector<2x32xf32>
    %55 = math.exp %54 : vector<2x32xf32>
    %cst_34 = arith.constant 1.000000e+00 : f32
    %56 = vector.broadcast %cst_34 : f32 to vector<2x32xf32>
    %57 = arith.addf %56, %55 : vector<2x32xf32>
    %58 = arith.divf %56, %57 : vector<2x32xf32>
    %59 = vector.extract_strided_slice %52 {offsets = [0, 32], sizes = [2, 32], strides = [1, 1]} : vector<2x128xf32> to vector<2x32xf32>
    %60 = arith.negf %59 : vector<2x32xf32>
    %61 = math.exp %60 : vector<2x32xf32>
    %cst_35 = arith.constant 1.000000e+00 : f32
    %62 = vector.broadcast %cst_35 : f32 to vector<2x32xf32>
    %63 = arith.addf %62, %61 : vector<2x32xf32>
    %64 = arith.divf %62, %63 : vector<2x32xf32>
    %65 = vector.extract_strided_slice %52 {offsets = [0, 64], sizes = [2, 32], strides = [1, 1]} : vector<2x128xf32> to vector<2x32xf32>
    %66 = math.tanh %65 : vector<2x32xf32>
    %67 = vector.extract_strided_slice %52 {offsets = [0, 96], sizes = [2, 32], strides = [1, 1]} : vector<2x128xf32> to vector<2x32xf32>
    %68 = arith.negf %67 : vector<2x32xf32>
    %69 = math.exp %68 : vector<2x32xf32>
    %cst_36 = arith.constant 1.000000e+00 : f32
    %70 = vector.broadcast %cst_36 : f32 to vector<2x32xf32>
    %71 = arith.addf %70, %69 : vector<2x32xf32>
    %72 = arith.divf %70, %71 : vector<2x32xf32>
    %73 = arith.mulf %64, %46 : vector<2x32xf32>
    %74 = arith.mulf %58, %66 : vector<2x32xf32>
    %75 = arith.addf %73, %74 : vector<2x32xf32>
    %76 = math.tanh %75 : vector<2x32xf32>
    %77 = arith.mulf %72, %76 : vector<2x32xf32>
    %c2_37 = arith.constant 2 : index
    %c0_38 = arith.constant 0 : index
    %78 = vector.load %arg17[%c2_37, %c0_38] : memref<16x32xf32, #tpu.memory_space<vmem>>, vector<2x32xf32>
    tpu.vector_store %arg17[%c2_37, %c0_38], %77 {strides = array<i32>} : memref<16x32xf32, #tpu.memory_space<vmem>>, vector<2x32xf32>,
    %c4 = arith.constant 4 : index
    %c0_39 = arith.constant 0 : index
    %79 = vector.load %arg16[%c4, %c0_39] : memref<16x128xf32, #tpu.memory_space<vmem>>, vector<2x128xf32>
    %cst_40 = arith.constant dense<0.000000e+00> : vector<2x128xf32>
    %80 = tpu.matmul %77, %11, %cst_40 {dimension_numbers = #tpu.dot_dimension_numbers<[1], [0], [0], [1], [0, 0, 1, 1], [], []>} : vector<2x32xf32>, vector<32x128xf32>, vector<2x128xf32> -> vector<2x128xf32>
    %81 = arith.addf %79, %80 : vector<2x128xf32>
    %82 = vector.extract_strided_slice %81 {offsets = [0, 0], sizes = [2, 32], strides = [1, 1]} : vector<2x128xf32> to vector<2x32xf32>
    %83 = arith.negf %82 : vector<2x32xf32>
    %84 = math.exp %83 : vector<2x32xf32>
    %cst_41 = arith.constant 1.000000e+00 : f32
    %85 = vector.broadcast %cst_41 : f32 to vector<2x32xf32>
    %86 = arith.addf %85, %84 : vector<2x32xf32>
    %87 = arith.divf %85, %86 : vector<2x32xf32>
    %88 = vector.extract_strided_slice %81 {offsets = [0, 32], sizes = [2, 32], strides = [1, 1]} : vector<2x128xf32> to vector<2x32xf32>
    %89 = arith.negf %88 : vector<2x32xf32>
    %90 = math.exp %89 : vector<2x32xf32>
    %cst_42 = arith.constant 1.000000e+00 : f32
    %91 = vector.broadcast %cst_42 : f32 to vector<2x32xf32>
    %92 = arith.addf %91, %90 : vector<2x32xf32>
    %93 = arith.divf %91, %92 : vector<2x32xf32>
    %94 = vector.extract_strided_slice %81 {offsets = [0, 64], sizes = [2, 32], strides = [1, 1]} : vector<2x128xf32> to vector<2x32xf32>
    %95 = math.tanh %94 : vector<2x32xf32>
    %96 = vector.extract_strided_slice %81 {offsets = [0, 96], sizes = [2, 32], strides = [1, 1]} : vector<2x128xf32> to vector<2x32xf32>
    %97 = arith.negf %96 : vector<2x32xf32>
    %98 = math.exp %97 : vector<2x32xf32>
    %cst_43 = arith.constant 1.000000e+00 : f32
    %99 = vector.broadcast %cst_43 : f32 to vector<2x32xf32>
    %100 = arith.addf %99, %98 : vector<2x32xf32>
    %101 = arith.divf %99, %100 : vector<2x32xf32>
    %102 = arith.mulf %93, %75 : vector<2x32xf32>
    %103 = arith.mulf %87, %95 : vector<2x32xf32>
    %104 = arith.addf %102, %103 : vector<2x32xf32>
    %105 = math.tanh %104 : vector<2x32xf32>
    %106 = arith.mulf %101, %105 : vector<2x32xf32>
    %c4_44 = arith.constant 4 : index
    %c0_45 = arith.constant 0 : index
    %107 = vector.load %arg17[%c4_44, %c0_45] : memref<16x32xf32, #tpu.memory_space<vmem>>, vector<2x32xf32>
    tpu.vector_store %arg17[%c4_44, %c0_45], %106 {strides = array<i32>} : memref<16x32xf32, #tpu.memory_space<vmem>>, vector<2x32xf32>,
    %c6 = arith.constant 6 : index
    %c0_46 = arith.constant 0 : index
    %108 = vector.load %arg16[%c6, %c0_46] : memref<16x128xf32, #tpu.memory_space<vmem>>, vector<2x128xf32>
    %cst_47 = arith.constant dense<0.000000e+00> : vector<2x128xf32>
    %109 = tpu.matmul %106, %11, %cst_47 {dimension_numbers = #tpu.dot_dimension_numbers<[1], [0], [0], [1], [0, 0, 1, 1], [], []>} : vector<2x32xf32>, vector<32x128xf32>, vector<2x128xf32> -> vector<2x128xf32>
    %110 = arith.addf %108, %109 : vector<2x128xf32>
    %111 = vector.extract_strided_slice %110 {offsets = [0, 0], sizes = [2, 32], strides = [1, 1]} : vector<2x128xf32> to vector<2x32xf32>
    %112 = arith.negf %111 : vector<2x32xf32>
    %113 = math.exp %112 : vector<2x32xf32>
    %cst_48 = arith.constant 1.000000e+00 : f32
    %114 = vector.broadcast %cst_48 : f32 to vector<2x32xf32>
    %115 = arith.addf %114, %113 : vector<2x32xf32>
    %116 = arith.divf %114, %115 : vector<2x32xf32>
    %117 = vector.extract_strided_slice %110 {offsets = [0, 32], sizes = [2, 32], strides = [1, 1]} : vector<2x128xf32> to vector<2x32xf32>
    %118 = arith.negf %117 : vector<2x32xf32>
    %119 = math.exp %118 : vector<2x32xf32>
    %cst_49 = arith.constant 1.000000e+00 : f32
    %120 = vector.broadcast %cst_49 : f32 to vector<2x32xf32>
    %121 = arith.addf %120, %119 : vector<2x32xf32>
    %122 = arith.divf %120, %121 : vector<2x32xf32>
    %123 = vector.extract_strided_slice %110 {offsets = [0, 64], sizes = [2, 32], strides = [1, 1]} : vector<2x128xf32> to vector<2x32xf32>
    %124 = math.tanh %123 : vector<2x32xf32>
    %125 = vector.extract_strided_slice %110 {offsets = [0, 96], sizes = [2, 32], strides = [1, 1]} : vector<2x128xf32> to vector<2x32xf32>
    %126 = arith.negf %125 : vector<2x32xf32>
    %127 = math.exp %126 : vector<2x32xf32>
    %cst_50 = arith.constant 1.000000e+00 : f32
    %128 = vector.broadcast %cst_50 : f32 to vector<2x32xf32>
    %129 = arith.addf %128, %127 : vector<2x32xf32>
    %130 = arith.divf %128, %129 : vector<2x32xf32>
    %131 = arith.mulf %122, %104 : vector<2x32xf32>
    %132 = arith.mulf %116, %124 : vector<2x32xf32>
    %133 = arith.addf %131, %132 : vector<2x32xf32>
    %134 = math.tanh %133 : vector<2x32xf32>
    %135 = arith.mulf %130, %134 : vector<2x32xf32>
    %c6_51 = arith.constant 6 : index
    %c0_52 = arith.constant 0 : index
    %136 = vector.load %arg17[%c6_51, %c0_52] : memref<16x32xf32, #tpu.memory_space<vmem>>, vector<2x32xf32>
    tpu.vector_store %arg17[%c6_51, %c0_52], %135 {strides = array<i32>} : memref<16x32xf32, #tpu.memory_space<vmem>>, vector<2x32xf32>,
    %c8 = arith.constant 8 : index
    %c0_53 = arith.constant 0 : index
    %137 = vector.load %arg16[%c8, %c0_53] : memref<16x128xf32, #tpu.memory_space<vmem>>, vector<2x128xf32>
    %cst_54 = arith.constant dense<0.000000e+00> : vector<2x128xf32>
    %138 = tpu.matmul %135, %11, %cst_54 {dimension_numbers = #tpu.dot_dimension_numbers<[1], [0], [0], [1], [0, 0, 1, 1], [], []>} : vector<2x32xf32>, vector<32x128xf32>, vector<2x128xf32> -> vector<2x128xf32>
    %139 = arith.addf %137, %138 : vector<2x128xf32>
    %140 = vector.extract_strided_slice %139 {offsets = [0, 0], sizes = [2, 32], strides = [1, 1]} : vector<2x128xf32> to vector<2x32xf32>
    %141 = arith.negf %140 : vector<2x32xf32>
    %142 = math.exp %141 : vector<2x32xf32>
    %cst_55 = arith.constant 1.000000e+00 : f32
    %143 = vector.broadcast %cst_55 : f32 to vector<2x32xf32>
    %144 = arith.addf %143, %142 : vector<2x32xf32>
    %145 = arith.divf %143, %144 : vector<2x32xf32>
    %146 = vector.extract_strided_slice %139 {offsets = [0, 32], sizes = [2, 32], strides = [1, 1]} : vector<2x128xf32> to vector<2x32xf32>
    %147 = arith.negf %146 : vector<2x32xf32>
    %148 = math.exp %147 : vector<2x32xf32>
    %cst_56 = arith.constant 1.000000e+00 : f32
    %149 = vector.broadcast %cst_56 : f32 to vector<2x32xf32>
    %150 = arith.addf %149, %148 : vector<2x32xf32>
    %151 = arith.divf %149, %150 : vector<2x32xf32>
    %152 = vector.extract_strided_slice %139 {offsets = [0, 64], sizes = [2, 32], strides = [1, 1]} : vector<2x128xf32> to vector<2x32xf32>
    %153 = math.tanh %152 : vector<2x32xf32>
    %154 = vector.extract_strided_slice %139 {offsets = [0, 96], sizes = [2, 32], strides = [1, 1]} : vector<2x128xf32> to vector<2x32xf32>
    %155 = arith.negf %154 : vector<2x32xf32>
    %156 = math.exp %155 : vector<2x32xf32>
    %cst_57 = arith.constant 1.000000e+00 : f32
    %157 = vector.broadcast %cst_57 : f32 to vector<2x32xf32>
    %158 = arith.addf %157, %156 : vector<2x32xf32>
    %159 = arith.divf %157, %158 : vector<2x32xf32>
    %160 = arith.mulf %151, %133 : vector<2x32xf32>
    %161 = arith.mulf %145, %153 : vector<2x32xf32>
    %162 = arith.addf %160, %161 : vector<2x32xf32>
    %163 = math.tanh %162 : vector<2x32xf32>
    %164 = arith.mulf %159, %163 : vector<2x32xf32>
    %c8_58 = arith.constant 8 : index
    %c0_59 = arith.constant 0 : index
    %165 = vector.load %arg17[%c8_58, %c0_59] : memref<16x32xf32, #tpu.memory_space<vmem>>, vector<2x32xf32>
    tpu.vector_store %arg17[%c8_58, %c0_59], %164 {strides = array<i32>} : memref<16x32xf32, #tpu.memory_space<vmem>>, vector<2x32xf32>,
    %c10 = arith.constant 10 : index
    %c0_60 = arith.constant 0 : index
    %166 = vector.load %arg16[%c10, %c0_60] : memref<16x128xf32, #tpu.memory_space<vmem>>, vector<2x128xf32>
    %cst_61 = arith.constant dense<0.000000e+00> : vector<2x128xf32>
    %167 = tpu.matmul %164, %11, %cst_61 {dimension_numbers = #tpu.dot_dimension_numbers<[1], [0], [0], [1], [0, 0, 1, 1], [], []>} : vector<2x32xf32>, vector<32x128xf32>, vector<2x128xf32> -> vector<2x128xf32>
    %168 = arith.addf %166, %167 : vector<2x128xf32>
    %169 = vector.extract_strided_slice %168 {offsets = [0, 0], sizes = [2, 32], strides = [1, 1]} : vector<2x128xf32> to vector<2x32xf32>
    %170 = arith.negf %169 : vector<2x32xf32>
    %171 = math.exp %170 : vector<2x32xf32>
    %cst_62 = arith.constant 1.000000e+00 : f32
    %172 = vector.broadcast %cst_62 : f32 to vector<2x32xf32>
    %173 = arith.addf %172, %171 : vector<2x32xf32>
    %174 = arith.divf %172, %173 : vector<2x32xf32>
    %175 = vector.extract_strided_slice %168 {offsets = [0, 32], sizes = [2, 32], strides = [1, 1]} : vector<2x128xf32> to vector<2x32xf32>
    %176 = arith.negf %175 : vector<2x32xf32>
    %177 = math.exp %176 : vector<2x32xf32>
    %cst_63 = arith.constant 1.000000e+00 : f32
    %178 = vector.broadcast %cst_63 : f32 to vector<2x32xf32>
    %179 = arith.addf %178, %177 : vector<2x32xf32>
    %180 = arith.divf %178, %179 : vector<2x32xf32>
    %181 = vector.extract_strided_slice %168 {offsets = [0, 64], sizes = [2, 32], strides = [1, 1]} : vector<2x128xf32> to vector<2x32xf32>
    %182 = math.tanh %181 : vector<2x32xf32>
    %183 = vector.extract_strided_slice %168 {offsets = [0, 96], sizes = [2, 32], strides = [1, 1]} : vector<2x128xf32> to vector<2x32xf32>
    %184 = arith.negf %183 : vector<2x32xf32>
    %185 = math.exp %184 : vector<2x32xf32>
    %cst_64 = arith.constant 1.000000e+00 : f32
    %186 = vector.broadcast %cst_64 : f32 to vector<2x32xf32>
    %187 = arith.addf %186, %185 : vector<2x32xf32>
    %188 = arith.divf %186, %187 : vector<2x32xf32>
    %189 = arith.mulf %180, %162 : vector<2x32xf32>
    %190 = arith.mulf %174, %182 : vector<2x32xf32>
    %191 = arith.addf %189, %190 : vector<2x32xf32>
    %192 = math.tanh %191 : vector<2x32xf32>
    %193 = arith.mulf %188, %192 : vector<2x32xf32>
    %c10_65 = arith.constant 10 : index
    %c0_66 = arith.constant 0 : index
    %194 = vector.load %arg17[%c10_65, %c0_66] : memref<16x32xf32, #tpu.memory_space<vmem>>, vector<2x32xf32>
    tpu.vector_store %arg17[%c10_65, %c0_66], %193 {strides = array<i32>} : memref<16x32xf32, #tpu.memory_space<vmem>>, vector<2x32xf32>,
    %c12 = arith.constant 12 : index
    %c0_67 = arith.constant 0 : index
    %195 = vector.load %arg16[%c12, %c0_67] : memref<16x128xf32, #tpu.memory_space<vmem>>, vector<2x128xf32>
    %cst_68 = arith.constant dense<0.000000e+00> : vector<2x128xf32>
    %196 = tpu.matmul %193, %11, %cst_68 {dimension_numbers = #tpu.dot_dimension_numbers<[1], [0], [0], [1], [0, 0, 1, 1], [], []>} : vector<2x32xf32>, vector<32x128xf32>, vector<2x128xf32> -> vector<2x128xf32>
    %197 = arith.addf %195, %196 : vector<2x128xf32>
    %198 = vector.extract_strided_slice %197 {offsets = [0, 0], sizes = [2, 32], strides = [1, 1]} : vector<2x128xf32> to vector<2x32xf32>
    %199 = arith.negf %198 : vector<2x32xf32>
    %200 = math.exp %199 : vector<2x32xf32>
    %cst_69 = arith.constant 1.000000e+00 : f32
    %201 = vector.broadcast %cst_69 : f32 to vector<2x32xf32>
    %202 = arith.addf %201, %200 : vector<2x32xf32>
    %203 = arith.divf %201, %202 : vector<2x32xf32>
    %204 = vector.extract_strided_slice %197 {offsets = [0, 32], sizes = [2, 32], strides = [1, 1]} : vector<2x128xf32> to vector<2x32xf32>
    %205 = arith.negf %204 : vector<2x32xf32>
    %206 = math.exp %205 : vector<2x32xf32>
    %cst_70 = arith.constant 1.000000e+00 : f32
    %207 = vector.broadcast %cst_70 : f32 to vector<2x32xf32>
    %208 = arith.addf %207, %206 : vector<2x32xf32>
    %209 = arith.divf %207, %208 : vector<2x32xf32>
    %210 = vector.extract_strided_slice %197 {offsets = [0, 64], sizes = [2, 32], strides = [1, 1]} : vector<2x128xf32> to vector<2x32xf32>
    %211 = math.tanh %210 : vector<2x32xf32>
    %212 = vector.extract_strided_slice %197 {offsets = [0, 96], sizes = [2, 32], strides = [1, 1]} : vector<2x128xf32> to vector<2x32xf32>
    %213 = arith.negf %212 : vector<2x32xf32>
    %214 = math.exp %213 : vector<2x32xf32>
    %cst_71 = arith.constant 1.000000e+00 : f32
    %215 = vector.broadcast %cst_71 : f32 to vector<2x32xf32>
    %216 = arith.addf %215, %214 : vector<2x32xf32>
    %217 = arith.divf %215, %216 : vector<2x32xf32>
    %218 = arith.mulf %209, %191 : vector<2x32xf32>
    %219 = arith.mulf %203, %211 : vector<2x32xf32>
    %220 = arith.addf %218, %219 : vector<2x32xf32>
    %221 = math.tanh %220 : vector<2x32xf32>
    %222 = arith.mulf %217, %221 : vector<2x32xf32>
    %c12_72 = arith.constant 12 : index
    %c0_73 = arith.constant 0 : index
    %223 = vector.load %arg17[%c12_72, %c0_73] : memref<16x32xf32, #tpu.memory_space<vmem>>, vector<2x32xf32>
    tpu.vector_store %arg17[%c12_72, %c0_73], %222 {strides = array<i32>} : memref<16x32xf32, #tpu.memory_space<vmem>>, vector<2x32xf32>,
    %c14 = arith.constant 14 : index
    %c0_74 = arith.constant 0 : index
    %224 = vector.load %arg16[%c14, %c0_74] : memref<16x128xf32, #tpu.memory_space<vmem>>, vector<2x128xf32>
    %cst_75 = arith.constant dense<0.000000e+00> : vector<2x128xf32>
    %225 = tpu.matmul %222, %11, %cst_75 {dimension_numbers = #tpu.dot_dimension_numbers<[1], [0], [0], [1], [0, 0, 1, 1], [], []>} : vector<2x32xf32>, vector<32x128xf32>, vector<2x128xf32> -> vector<2x128xf32>
    %226 = arith.addf %224, %225 : vector<2x128xf32>
    %227 = vector.extract_strided_slice %226 {offsets = [0, 0], sizes = [2, 32], strides = [1, 1]} : vector<2x128xf32> to vector<2x32xf32>
    %228 = arith.negf %227 : vector<2x32xf32>
    %229 = math.exp %228 : vector<2x32xf32>
    %cst_76 = arith.constant 1.000000e+00 : f32
    %230 = vector.broadcast %cst_76 : f32 to vector<2x32xf32>
    %231 = arith.addf %230, %229 : vector<2x32xf32>
    %232 = arith.divf %230, %231 : vector<2x32xf32>
    %233 = vector.extract_strided_slice %226 {offsets = [0, 32], sizes = [2, 32], strides = [1, 1]} : vector<2x128xf32> to vector<2x32xf32>
    %234 = arith.negf %233 : vector<2x32xf32>
    %235 = math.exp %234 : vector<2x32xf32>
    %cst_77 = arith.constant 1.000000e+00 : f32
    %236 = vector.broadcast %cst_77 : f32 to vector<2x32xf32>
    %237 = arith.addf %236, %235 : vector<2x32xf32>
    %238 = arith.divf %236, %237 : vector<2x32xf32>
    %239 = vector.extract_strided_slice %226 {offsets = [0, 64], sizes = [2, 32], strides = [1, 1]} : vector<2x128xf32> to vector<2x32xf32>
    %240 = math.tanh %239 : vector<2x32xf32>
    %241 = vector.extract_strided_slice %226 {offsets = [0, 96], sizes = [2, 32], strides = [1, 1]} : vector<2x128xf32> to vector<2x32xf32>
    %242 = arith.negf %241 : vector<2x32xf32>
    %243 = math.exp %242 : vector<2x32xf32>
    %cst_78 = arith.constant 1.000000e+00 : f32
    %244 = vector.broadcast %cst_78 : f32 to vector<2x32xf32>
    %245 = arith.addf %244, %243 : vector<2x32xf32>
    %246 = arith.divf %244, %245 : vector<2x32xf32>
    %247 = arith.mulf %238, %220 : vector<2x32xf32>
    %248 = arith.mulf %232, %240 : vector<2x32xf32>
    %249 = arith.addf %247, %248 : vector<2x32xf32>
    %250 = math.tanh %249 : vector<2x32xf32>
    %251 = arith.mulf %246, %250 : vector<2x32xf32>
    %c14_79 = arith.constant 14 : index
    %c0_80 = arith.constant 0 : index
    %252 = vector.load %arg17[%c14_79, %c0_80] : memref<16x32xf32, #tpu.memory_space<vmem>>, vector<2x32xf32>
    tpu.vector_store %arg17[%c14_79, %c0_80], %251 {strides = array<i32>} : memref<16x32xf32, #tpu.memory_space<vmem>>, vector<2x32xf32>,
    %c0_81 = arith.constant 0 : index
    %c0_82 = arith.constant 0 : index
    %c0_83 = arith.constant 0 : index
    %253 = vector.load %arg14[%c0_81, %c0_82, %c0_83] : memref<2x2x32xf32, #tpu.memory_space<vmem>>, vector<1x2x32xf32>
    %254 = vector.shape_cast %253 : vector<1x2x32xf32> to vector<2x32xf32>
    %255 = vector.shape_cast %251 : vector<2x32xf32> to vector<1x2x32xf32>
    tpu.vector_store %arg14[%c0_81, %c0_82, %c0_83], %255 {strides = array<i32>} : memref<2x2x32xf32, #tpu.memory_space<vmem>>, vector<1x2x32xf32>,
    %c0_84 = arith.constant 0 : index
    %c0_85 = arith.constant 0 : index
    %c0_86 = arith.constant 0 : index
    %256 = vector.load %arg15[%c0_84, %c0_85, %c0_86] : memref<2x2x32xf32, #tpu.memory_space<vmem>>, vector<1x2x32xf32>
    %257 = vector.shape_cast %256 : vector<1x2x32xf32> to vector<2x32xf32>
    %258 = vector.shape_cast %249 : vector<2x32xf32> to vector<1x2x32xf32>
    tpu.vector_store %arg15[%c0_84, %c0_85, %c0_86], %258 {strides = array<i32>} : memref<2x2x32xf32, #tpu.memory_space<vmem>>, vector<1x2x32xf32>,
    %c0_87 = arith.constant 0 : index
    %c0_88 = arith.constant 0 : index
    %259 = vector.load %arg17[%c0_87, %c0_88] : memref<16x32xf32, #tpu.memory_space<vmem>>, vector<16x32xf32>
    %c0_89 = arith.constant 0 : index
    %c0_90 = arith.constant 0 : index
    %260 = vector.load %arg10[%c0_89, %c0_90] : memref<32x128xf32, #tpu.memory_space<vmem>>, vector<32x128xf32>
    %c0_91 = arith.constant 0 : index
    %c0_92 = arith.constant 0 : index
    %261 = vector.load %arg11[%c0_91, %c0_92] : memref<32x128xf32, #tpu.memory_space<vmem>>, vector<32x128xf32>
    %c0_93 = arith.constant 0 : index
    %c0_94 = arith.constant 0 : index
    %262 = vector.load %arg12[%c0_93, %c0_94] : memref<1x128xf32, #tpu.memory_space<vmem>>, vector<1x128xf32>
    %cst_95 = arith.constant dense<0.000000e+00> : vector<16x128xf32>
    %263 = tpu.matmul %259, %260, %cst_95 {dimension_numbers = #tpu.dot_dimension_numbers<[1], [0], [0], [1], [0, 0, 1, 1], [], []>} : vector<16x32xf32>, vector<32x128xf32>, vector<16x128xf32> -> vector<16x128xf32>
    %264 = vector.broadcast %262 : vector<1x128xf32> to vector<16x128xf32>
    %265 = arith.addf %263, %264 : vector<16x128xf32>
    %c0_96 = arith.constant 0 : index
    %c0_97 = arith.constant 0 : index
    %266 = vector.load %arg16[%c0_96, %c0_97] : memref<16x128xf32, #tpu.memory_space<vmem>>, vector<16x128xf32>
    tpu.vector_store %arg16[%c0_96, %c0_97], %265 {strides = array<i32>} : memref<16x128xf32, #tpu.memory_space<vmem>>, vector<16x128xf32>,
    %c1 = arith.constant 1 : index
    %c0_98 = arith.constant 0 : index
    %c0_99 = arith.constant 0 : index
    %267 = vector.load %arg3[%c1, %c0_98, %c0_99] : memref<2x2x32xf32, #tpu.memory_space<vmem>>, vector<1x2x32xf32>
    %268 = vector.shape_cast %267 : vector<1x2x32xf32> to vector<2x32xf32>
    %c1_100 = arith.constant 1 : index
    %c0_101 = arith.constant 0 : index
    %c0_102 = arith.constant 0 : index
    %269 = vector.load %arg4[%c1_100, %c0_101, %c0_102] : memref<2x2x32xf32, #tpu.memory_space<vmem>>, vector<1x2x32xf32>
    %270 = vector.shape_cast %269 : vector<1x2x32xf32> to vector<2x32xf32>
    %c0_103 = arith.constant 0 : index
    %c0_104 = arith.constant 0 : index
    %271 = vector.load %arg16[%c0_103, %c0_104] : memref<16x128xf32, #tpu.memory_space<vmem>>, vector<2x128xf32>
    %cst_105 = arith.constant dense<0.000000e+00> : vector<2x128xf32>
    %272 = tpu.matmul %268, %261, %cst_105 {dimension_numbers = #tpu.dot_dimension_numbers<[1], [0], [0], [1], [0, 0, 1, 1], [], []>} : vector<2x32xf32>, vector<32x128xf32>, vector<2x128xf32> -> vector<2x128xf32>
    %273 = arith.addf %271, %272 : vector<2x128xf32>
    %274 = vector.extract_strided_slice %273 {offsets = [0, 0], sizes = [2, 32], strides = [1, 1]} : vector<2x128xf32> to vector<2x32xf32>
    %275 = arith.negf %274 : vector<2x32xf32>
    %276 = math.exp %275 : vector<2x32xf32>
    %cst_106 = arith.constant 1.000000e+00 : f32
    %277 = vector.broadcast %cst_106 : f32 to vector<2x32xf32>
    %278 = arith.addf %277, %276 : vector<2x32xf32>
    %279 = arith.divf %277, %278 : vector<2x32xf32>
    %280 = vector.extract_strided_slice %273 {offsets = [0, 32], sizes = [2, 32], strides = [1, 1]} : vector<2x128xf32> to vector<2x32xf32>
    %281 = arith.negf %280 : vector<2x32xf32>
    %282 = math.exp %281 : vector<2x32xf32>
    %cst_107 = arith.constant 1.000000e+00 : f32
    %283 = vector.broadcast %cst_107 : f32 to vector<2x32xf32>
    %284 = arith.addf %283, %282 : vector<2x32xf32>
    %285 = arith.divf %283, %284 : vector<2x32xf32>
    %286 = vector.extract_strided_slice %273 {offsets = [0, 64], sizes = [2, 32], strides = [1, 1]} : vector<2x128xf32> to vector<2x32xf32>
    %287 = math.tanh %286 : vector<2x32xf32>
    %288 = vector.extract_strided_slice %273 {offsets = [0, 96], sizes = [2, 32], strides = [1, 1]} : vector<2x128xf32> to vector<2x32xf32>
    %289 = arith.negf %288 : vector<2x32xf32>
    %290 = math.exp %289 : vector<2x32xf32>
    %cst_108 = arith.constant 1.000000e+00 : f32
    %291 = vector.broadcast %cst_108 : f32 to vector<2x32xf32>
    %292 = arith.addf %291, %290 : vector<2x32xf32>
    %293 = arith.divf %291, %292 : vector<2x32xf32>
    %294 = arith.mulf %285, %270 : vector<2x32xf32>
    %295 = arith.mulf %279, %287 : vector<2x32xf32>
    %296 = arith.addf %294, %295 : vector<2x32xf32>
    %297 = math.tanh %296 : vector<2x32xf32>
    %298 = arith.mulf %293, %297 : vector<2x32xf32>
    %c0_109 = arith.constant 0 : index
    %c0_110 = arith.constant 0 : index
    %299 = vector.load %arg17[%c0_109, %c0_110] : memref<16x32xf32, #tpu.memory_space<vmem>>, vector<2x32xf32>
    tpu.vector_store %arg17[%c0_109, %c0_110], %298 {strides = array<i32>} : memref<16x32xf32, #tpu.memory_space<vmem>>, vector<2x32xf32>,
    %c2_111 = arith.constant 2 : index
    %c0_112 = arith.constant 0 : index
    %300 = vector.load %arg16[%c2_111, %c0_112] : memref<16x128xf32, #tpu.memory_space<vmem>>, vector<2x128xf32>
    %cst_113 = arith.constant dense<0.000000e+00> : vector<2x128xf32>
    %301 = tpu.matmul %298, %261, %cst_113 {dimension_numbers = #tpu.dot_dimension_numbers<[1], [0], [0], [1], [0, 0, 1, 1], [], []>} : vector<2x32xf32>, vector<32x128xf32>, vector<2x128xf32> -> vector<2x128xf32>
    %302 = arith.addf %300, %301 : vector<2x128xf32>
    %303 = vector.extract_strided_slice %302 {offsets = [0, 0], sizes = [2, 32], strides = [1, 1]} : vector<2x128xf32> to vector<2x32xf32>
    %304 = arith.negf %303 : vector<2x32xf32>
    %305 = math.exp %304 : vector<2x32xf32>
    %cst_114 = arith.constant 1.000000e+00 : f32
    %306 = vector.broadcast %cst_114 : f32 to vector<2x32xf32>
    %307 = arith.addf %306, %305 : vector<2x32xf32>
    %308 = arith.divf %306, %307 : vector<2x32xf32>
    %309 = vector.extract_strided_slice %302 {offsets = [0, 32], sizes = [2, 32], strides = [1, 1]} : vector<2x128xf32> to vector<2x32xf32>
    %310 = arith.negf %309 : vector<2x32xf32>
    %311 = math.exp %310 : vector<2x32xf32>
    %cst_115 = arith.constant 1.000000e+00 : f32
    %312 = vector.broadcast %cst_115 : f32 to vector<2x32xf32>
    %313 = arith.addf %312, %311 : vector<2x32xf32>
    %314 = arith.divf %312, %313 : vector<2x32xf32>
    %315 = vector.extract_strided_slice %302 {offsets = [0, 64], sizes = [2, 32], strides = [1, 1]} : vector<2x128xf32> to vector<2x32xf32>
    %316 = math.tanh %315 : vector<2x32xf32>
    %317 = vector.extract_strided_slice %302 {offsets = [0, 96], sizes = [2, 32], strides = [1, 1]} : vector<2x128xf32> to vector<2x32xf32>
    %318 = arith.negf %317 : vector<2x32xf32>
    %319 = math.exp %318 : vector<2x32xf32>
    %cst_116 = arith.constant 1.000000e+00 : f32
    %320 = vector.broadcast %cst_116 : f32 to vector<2x32xf32>
    %321 = arith.addf %320, %319 : vector<2x32xf32>
    %322 = arith.divf %320, %321 : vector<2x32xf32>
    %323 = arith.mulf %314, %296 : vector<2x32xf32>
    %324 = arith.mulf %308, %316 : vector<2x32xf32>
    %325 = arith.addf %323, %324 : vector<2x32xf32>
    %326 = math.tanh %325 : vector<2x32xf32>
    %327 = arith.mulf %322, %326 : vector<2x32xf32>
    %c2_117 = arith.constant 2 : index
    %c0_118 = arith.constant 0 : index
    %328 = vector.load %arg17[%c2_117, %c0_118] : memref<16x32xf32, #tpu.memory_space<vmem>>, vector<2x32xf32>
    tpu.vector_store %arg17[%c2_117, %c0_118], %327 {strides = array<i32>} : memref<16x32xf32, #tpu.memory_space<vmem>>, vector<2x32xf32>,
    %c4_119 = arith.constant 4 : index
    %c0_120 = arith.constant 0 : index
    %329 = vector.load %arg16[%c4_119, %c0_120] : memref<16x128xf32, #tpu.memory_space<vmem>>, vector<2x128xf32>
    %cst_121 = arith.constant dense<0.000000e+00> : vector<2x128xf32>
    %330 = tpu.matmul %327, %261, %cst_121 {dimension_numbers = #tpu.dot_dimension_numbers<[1], [0], [0], [1], [0, 0, 1, 1], [], []>} : vector<2x32xf32>, vector<32x128xf32>, vector<2x128xf32> -> vector<2x128xf32>
    %331 = arith.addf %329, %330 : vector<2x128xf32>
    %332 = vector.extract_strided_slice %331 {offsets = [0, 0], sizes = [2, 32], strides = [1, 1]} : vector<2x128xf32> to vector<2x32xf32>
    %333 = arith.negf %332 : vector<2x32xf32>
    %334 = math.exp %333 : vector<2x32xf32>
    %cst_122 = arith.constant 1.000000e+00 : f32
    %335 = vector.broadcast %cst_122 : f32 to vector<2x32xf32>
    %336 = arith.addf %335, %334 : vector<2x32xf32>
    %337 = arith.divf %335, %336 : vector<2x32xf32>
    %338 = vector.extract_strided_slice %331 {offsets = [0, 32], sizes = [2, 32], strides = [1, 1]} : vector<2x128xf32> to vector<2x32xf32>
    %339 = arith.negf %338 : vector<2x32xf32>
    %340 = math.exp %339 : vector<2x32xf32>
    %cst_123 = arith.constant 1.000000e+00 : f32
    %341 = vector.broadcast %cst_123 : f32 to vector<2x32xf32>
    %342 = arith.addf %341, %340 : vector<2x32xf32>
    %343 = arith.divf %341, %342 : vector<2x32xf32>
    %344 = vector.extract_strided_slice %331 {offsets = [0, 64], sizes = [2, 32], strides = [1, 1]} : vector<2x128xf32> to vector<2x32xf32>
    %345 = math.tanh %344 : vector<2x32xf32>
    %346 = vector.extract_strided_slice %331 {offsets = [0, 96], sizes = [2, 32], strides = [1, 1]} : vector<2x128xf32> to vector<2x32xf32>
    %347 = arith.negf %346 : vector<2x32xf32>
    %348 = math.exp %347 : vector<2x32xf32>
    %cst_124 = arith.constant 1.000000e+00 : f32
    %349 = vector.broadcast %cst_124 : f32 to vector<2x32xf32>
    %350 = arith.addf %349, %348 : vector<2x32xf32>
    %351 = arith.divf %349, %350 : vector<2x32xf32>
    %352 = arith.mulf %343, %325 : vector<2x32xf32>
    %353 = arith.mulf %337, %345 : vector<2x32xf32>
    %354 = arith.addf %352, %353 : vector<2x32xf32>
    %355 = math.tanh %354 : vector<2x32xf32>
    %356 = arith.mulf %351, %355 : vector<2x32xf32>
    %c4_125 = arith.constant 4 : index
    %c0_126 = arith.constant 0 : index
    %357 = vector.load %arg17[%c4_125, %c0_126] : memref<16x32xf32, #tpu.memory_space<vmem>>, vector<2x32xf32>
    tpu.vector_store %arg17[%c4_125, %c0_126], %356 {strides = array<i32>} : memref<16x32xf32, #tpu.memory_space<vmem>>, vector<2x32xf32>,
    %c6_127 = arith.constant 6 : index
    %c0_128 = arith.constant 0 : index
    %358 = vector.load %arg16[%c6_127, %c0_128] : memref<16x128xf32, #tpu.memory_space<vmem>>, vector<2x128xf32>
    %cst_129 = arith.constant dense<0.000000e+00> : vector<2x128xf32>
    %359 = tpu.matmul %356, %261, %cst_129 {dimension_numbers = #tpu.dot_dimension_numbers<[1], [0], [0], [1], [0, 0, 1, 1], [], []>} : vector<2x32xf32>, vector<32x128xf32>, vector<2x128xf32> -> vector<2x128xf32>
    %360 = arith.addf %358, %359 : vector<2x128xf32>
    %361 = vector.extract_strided_slice %360 {offsets = [0, 0], sizes = [2, 32], strides = [1, 1]} : vector<2x128xf32> to vector<2x32xf32>
    %362 = arith.negf %361 : vector<2x32xf32>
    %363 = math.exp %362 : vector<2x32xf32>
    %cst_130 = arith.constant 1.000000e+00 : f32
    %364 = vector.broadcast %cst_130 : f32 to vector<2x32xf32>
    %365 = arith.addf %364, %363 : vector<2x32xf32>
    %366 = arith.divf %364, %365 : vector<2x32xf32>
    %367 = vector.extract_strided_slice %360 {offsets = [0, 32], sizes = [2, 32], strides = [1, 1]} : vector<2x128xf32> to vector<2x32xf32>
    %368 = arith.negf %367 : vector<2x32xf32>
    %369 = math.exp %368 : vector<2x32xf32>
    %cst_131 = arith.constant 1.000000e+00 : f32
    %370 = vector.broadcast %cst_131 : f32 to vector<2x32xf32>
    %371 = arith.addf %370, %369 : vector<2x32xf32>
    %372 = arith.divf %370, %371 : vector<2x32xf32>
    %373 = vector.extract_strided_slice %360 {offsets = [0, 64], sizes = [2, 32], strides = [1, 1]} : vector<2x128xf32> to vector<2x32xf32>
    %374 = math.tanh %373 : vector<2x32xf32>
    %375 = vector.extract_strided_slice %360 {offsets = [0, 96], sizes = [2, 32], strides = [1, 1]} : vector<2x128xf32> to vector<2x32xf32>
    %376 = arith.negf %375 : vector<2x32xf32>
    %377 = math.exp %376 : vector<2x32xf32>
    %cst_132 = arith.constant 1.000000e+00 : f32
    %378 = vector.broadcast %cst_132 : f32 to vector<2x32xf32>
    %379 = arith.addf %378, %377 : vector<2x32xf32>
    %380 = arith.divf %378, %379 : vector<2x32xf32>
    %381 = arith.mulf %372, %354 : vector<2x32xf32>
    %382 = arith.mulf %366, %374 : vector<2x32xf32>
    %383 = arith.addf %381, %382 : vector<2x32xf32>
    %384 = math.tanh %383 : vector<2x32xf32>
    %385 = arith.mulf %380, %384 : vector<2x32xf32>
    %c6_133 = arith.constant 6 : index
    %c0_134 = arith.constant 0 : index
    %386 = vector.load %arg17[%c6_133, %c0_134] : memref<16x32xf32, #tpu.memory_space<vmem>>, vector<2x32xf32>
    tpu.vector_store %arg17[%c6_133, %c0_134], %385 {strides = array<i32>} : memref<16x32xf32, #tpu.memory_space<vmem>>, vector<2x32xf32>,
    %c8_135 = arith.constant 8 : index
    %c0_136 = arith.constant 0 : index
    %387 = vector.load %arg16[%c8_135, %c0_136] : memref<16x128xf32, #tpu.memory_space<vmem>>, vector<2x128xf32>
    %cst_137 = arith.constant dense<0.000000e+00> : vector<2x128xf32>
    %388 = tpu.matmul %385, %261, %cst_137 {dimension_numbers = #tpu.dot_dimension_numbers<[1], [0], [0], [1], [0, 0, 1, 1], [], []>} : vector<2x32xf32>, vector<32x128xf32>, vector<2x128xf32> -> vector<2x128xf32>
    %389 = arith.addf %387, %388 : vector<2x128xf32>
    %390 = vector.extract_strided_slice %389 {offsets = [0, 0], sizes = [2, 32], strides = [1, 1]} : vector<2x128xf32> to vector<2x32xf32>
    %391 = arith.negf %390 : vector<2x32xf32>
    %392 = math.exp %391 : vector<2x32xf32>
    %cst_138 = arith.constant 1.000000e+00 : f32
    %393 = vector.broadcast %cst_138 : f32 to vector<2x32xf32>
    %394 = arith.addf %393, %392 : vector<2x32xf32>
    %395 = arith.divf %393, %394 : vector<2x32xf32>
    %396 = vector.extract_strided_slice %389 {offsets = [0, 32], sizes = [2, 32], strides = [1, 1]} : vector<2x128xf32> to vector<2x32xf32>
    %397 = arith.negf %396 : vector<2x32xf32>
    %398 = math.exp %397 : vector<2x32xf32>
    %cst_139 = arith.constant 1.000000e+00 : f32
    %399 = vector.broadcast %cst_139 : f32 to vector<2x32xf32>
    %400 = arith.addf %399, %398 : vector<2x32xf32>
    %401 = arith.divf %399, %400 : vector<2x32xf32>
    %402 = vector.extract_strided_slice %389 {offsets = [0, 64], sizes = [2, 32], strides = [1, 1]} : vector<2x128xf32> to vector<2x32xf32>
    %403 = math.tanh %402 : vector<2x32xf32>
    %404 = vector.extract_strided_slice %389 {offsets = [0, 96], sizes = [2, 32], strides = [1, 1]} : vector<2x128xf32> to vector<2x32xf32>
    %405 = arith.negf %404 : vector<2x32xf32>
    %406 = math.exp %405 : vector<2x32xf32>
    %cst_140 = arith.constant 1.000000e+00 : f32
    %407 = vector.broadcast %cst_140 : f32 to vector<2x32xf32>
    %408 = arith.addf %407, %406 : vector<2x32xf32>
    %409 = arith.divf %407, %408 : vector<2x32xf32>
    %410 = arith.mulf %401, %383 : vector<2x32xf32>
    %411 = arith.mulf %395, %403 : vector<2x32xf32>
    %412 = arith.addf %410, %411 : vector<2x32xf32>
    %413 = math.tanh %412 : vector<2x32xf32>
    %414 = arith.mulf %409, %413 : vector<2x32xf32>
    %c8_141 = arith.constant 8 : index
    %c0_142 = arith.constant 0 : index
    %415 = vector.load %arg17[%c8_141, %c0_142] : memref<16x32xf32, #tpu.memory_space<vmem>>, vector<2x32xf32>
    tpu.vector_store %arg17[%c8_141, %c0_142], %414 {strides = array<i32>} : memref<16x32xf32, #tpu.memory_space<vmem>>, vector<2x32xf32>,
    %c10_143 = arith.constant 10 : index
    %c0_144 = arith.constant 0 : index
    %416 = vector.load %arg16[%c10_143, %c0_144] : memref<16x128xf32, #tpu.memory_space<vmem>>, vector<2x128xf32>
    %cst_145 = arith.constant dense<0.000000e+00> : vector<2x128xf32>
    %417 = tpu.matmul %414, %261, %cst_145 {dimension_numbers = #tpu.dot_dimension_numbers<[1], [0], [0], [1], [0, 0, 1, 1], [], []>} : vector<2x32xf32>, vector<32x128xf32>, vector<2x128xf32> -> vector<2x128xf32>
    %418 = arith.addf %416, %417 : vector<2x128xf32>
    %419 = vector.extract_strided_slice %418 {offsets = [0, 0], sizes = [2, 32], strides = [1, 1]} : vector<2x128xf32> to vector<2x32xf32>
    %420 = arith.negf %419 : vector<2x32xf32>
    %421 = math.exp %420 : vector<2x32xf32>
    %cst_146 = arith.constant 1.000000e+00 : f32
    %422 = vector.broadcast %cst_146 : f32 to vector<2x32xf32>
    %423 = arith.addf %422, %421 : vector<2x32xf32>
    %424 = arith.divf %422, %423 : vector<2x32xf32>
    %425 = vector.extract_strided_slice %418 {offsets = [0, 32], sizes = [2, 32], strides = [1, 1]} : vector<2x128xf32> to vector<2x32xf32>
    %426 = arith.negf %425 : vector<2x32xf32>
    %427 = math.exp %426 : vector<2x32xf32>
    %cst_147 = arith.constant 1.000000e+00 : f32
    %428 = vector.broadcast %cst_147 : f32 to vector<2x32xf32>
    %429 = arith.addf %428, %427 : vector<2x32xf32>
    %430 = arith.divf %428, %429 : vector<2x32xf32>
    %431 = vector.extract_strided_slice %418 {offsets = [0, 64], sizes = [2, 32], strides = [1, 1]} : vector<2x128xf32> to vector<2x32xf32>
    %432 = math.tanh %431 : vector<2x32xf32>
    %433 = vector.extract_strided_slice %418 {offsets = [0, 96], sizes = [2, 32], strides = [1, 1]} : vector<2x128xf32> to vector<2x32xf32>
    %434 = arith.negf %433 : vector<2x32xf32>
    %435 = math.exp %434 : vector<2x32xf32>
    %cst_148 = arith.constant 1.000000e+00 : f32
    %436 = vector.broadcast %cst_148 : f32 to vector<2x32xf32>
    %437 = arith.addf %436, %435 : vector<2x32xf32>
    %438 = arith.divf %436, %437 : vector<2x32xf32>
    %439 = arith.mulf %430, %412 : vector<2x32xf32>
    %440 = arith.mulf %424, %432 : vector<2x32xf32>
    %441 = arith.addf %439, %440 : vector<2x32xf32>
    %442 = math.tanh %441 : vector<2x32xf32>
    %443 = arith.mulf %438, %442 : vector<2x32xf32>
    %c10_149 = arith.constant 10 : index
    %c0_150 = arith.constant 0 : index
    %444 = vector.load %arg17[%c10_149, %c0_150] : memref<16x32xf32, #tpu.memory_space<vmem>>, vector<2x32xf32>
    tpu.vector_store %arg17[%c10_149, %c0_150], %443 {strides = array<i32>} : memref<16x32xf32, #tpu.memory_space<vmem>>, vector<2x32xf32>,
    %c12_151 = arith.constant 12 : index
    %c0_152 = arith.constant 0 : index
    %445 = vector.load %arg16[%c12_151, %c0_152] : memref<16x128xf32, #tpu.memory_space<vmem>>, vector<2x128xf32>
    %cst_153 = arith.constant dense<0.000000e+00> : vector<2x128xf32>
    %446 = tpu.matmul %443, %261, %cst_153 {dimension_numbers = #tpu.dot_dimension_numbers<[1], [0], [0], [1], [0, 0, 1, 1], [], []>} : vector<2x32xf32>, vector<32x128xf32>, vector<2x128xf32> -> vector<2x128xf32>
    %447 = arith.addf %445, %446 : vector<2x128xf32>
    %448 = vector.extract_strided_slice %447 {offsets = [0, 0], sizes = [2, 32], strides = [1, 1]} : vector<2x128xf32> to vector<2x32xf32>
    %449 = arith.negf %448 : vector<2x32xf32>
    %450 = math.exp %449 : vector<2x32xf32>
    %cst_154 = arith.constant 1.000000e+00 : f32
    %451 = vector.broadcast %cst_154 : f32 to vector<2x32xf32>
    %452 = arith.addf %451, %450 : vector<2x32xf32>
    %453 = arith.divf %451, %452 : vector<2x32xf32>
    %454 = vector.extract_strided_slice %447 {offsets = [0, 32], sizes = [2, 32], strides = [1, 1]} : vector<2x128xf32> to vector<2x32xf32>
    %455 = arith.negf %454 : vector<2x32xf32>
    %456 = math.exp %455 : vector<2x32xf32>
    %cst_155 = arith.constant 1.000000e+00 : f32
    %457 = vector.broadcast %cst_155 : f32 to vector<2x32xf32>
    %458 = arith.addf %457, %456 : vector<2x32xf32>
    %459 = arith.divf %457, %458 : vector<2x32xf32>
    %460 = vector.extract_strided_slice %447 {offsets = [0, 64], sizes = [2, 32], strides = [1, 1]} : vector<2x128xf32> to vector<2x32xf32>
    %461 = math.tanh %460 : vector<2x32xf32>
    %462 = vector.extract_strided_slice %447 {offsets = [0, 96], sizes = [2, 32], strides = [1, 1]} : vector<2x128xf32> to vector<2x32xf32>
    %463 = arith.negf %462 : vector<2x32xf32>
    %464 = math.exp %463 : vector<2x32xf32>
    %cst_156 = arith.constant 1.000000e+00 : f32
    %465 = vector.broadcast %cst_156 : f32 to vector<2x32xf32>
    %466 = arith.addf %465, %464 : vector<2x32xf32>
    %467 = arith.divf %465, %466 : vector<2x32xf32>
    %468 = arith.mulf %459, %441 : vector<2x32xf32>
    %469 = arith.mulf %453, %461 : vector<2x32xf32>
    %470 = arith.addf %468, %469 : vector<2x32xf32>
    %471 = math.tanh %470 : vector<2x32xf32>
    %472 = arith.mulf %467, %471 : vector<2x32xf32>
    %c12_157 = arith.constant 12 : index
    %c0_158 = arith.constant 0 : index
    %473 = vector.load %arg17[%c12_157, %c0_158] : memref<16x32xf32, #tpu.memory_space<vmem>>, vector<2x32xf32>
    tpu.vector_store %arg17[%c12_157, %c0_158], %472 {strides = array<i32>} : memref<16x32xf32, #tpu.memory_space<vmem>>, vector<2x32xf32>,
    %c14_159 = arith.constant 14 : index
    %c0_160 = arith.constant 0 : index
    %474 = vector.load %arg16[%c14_159, %c0_160] : memref<16x128xf32, #tpu.memory_space<vmem>>, vector<2x128xf32>
    %cst_161 = arith.constant dense<0.000000e+00> : vector<2x128xf32>
    %475 = tpu.matmul %472, %261, %cst_161 {dimension_numbers = #tpu.dot_dimension_numbers<[1], [0], [0], [1], [0, 0, 1, 1], [], []>} : vector<2x32xf32>, vector<32x128xf32>, vector<2x128xf32> -> vector<2x128xf32>
    %476 = arith.addf %474, %475 : vector<2x128xf32>
    %477 = vector.extract_strided_slice %476 {offsets = [0, 0], sizes = [2, 32], strides = [1, 1]} : vector<2x128xf32> to vector<2x32xf32>
    %478 = arith.negf %477 : vector<2x32xf32>
    %479 = math.exp %478 : vector<2x32xf32>
    %cst_162 = arith.constant 1.000000e+00 : f32
    %480 = vector.broadcast %cst_162 : f32 to vector<2x32xf32>
    %481 = arith.addf %480, %479 : vector<2x32xf32>
    %482 = arith.divf %480, %481 : vector<2x32xf32>
    %483 = vector.extract_strided_slice %476 {offsets = [0, 32], sizes = [2, 32], strides = [1, 1]} : vector<2x128xf32> to vector<2x32xf32>
    %484 = arith.negf %483 : vector<2x32xf32>
    %485 = math.exp %484 : vector<2x32xf32>
    %cst_163 = arith.constant 1.000000e+00 : f32
    %486 = vector.broadcast %cst_163 : f32 to vector<2x32xf32>
    %487 = arith.addf %486, %485 : vector<2x32xf32>
    %488 = arith.divf %486, %487 : vector<2x32xf32>
    %489 = vector.extract_strided_slice %476 {offsets = [0, 64], sizes = [2, 32], strides = [1, 1]} : vector<2x128xf32> to vector<2x32xf32>
    %490 = math.tanh %489 : vector<2x32xf32>
    %491 = vector.extract_strided_slice %476 {offsets = [0, 96], sizes = [2, 32], strides = [1, 1]} : vector<2x128xf32> to vector<2x32xf32>
    %492 = arith.negf %491 : vector<2x32xf32>
    %493 = math.exp %492 : vector<2x32xf32>
    %cst_164 = arith.constant 1.000000e+00 : f32
    %494 = vector.broadcast %cst_164 : f32 to vector<2x32xf32>
    %495 = arith.addf %494, %493 : vector<2x32xf32>
    %496 = arith.divf %494, %495 : vector<2x32xf32>
    %497 = arith.mulf %488, %470 : vector<2x32xf32>
    %498 = arith.mulf %482, %490 : vector<2x32xf32>
    %499 = arith.addf %497, %498 : vector<2x32xf32>
    %500 = math.tanh %499 : vector<2x32xf32>
    %501 = arith.mulf %496, %500 : vector<2x32xf32>
    %c14_165 = arith.constant 14 : index
    %c0_166 = arith.constant 0 : index
    %502 = vector.load %arg17[%c14_165, %c0_166] : memref<16x32xf32, #tpu.memory_space<vmem>>, vector<2x32xf32>
    tpu.vector_store %arg17[%c14_165, %c0_166], %501 {strides = array<i32>} : memref<16x32xf32, #tpu.memory_space<vmem>>, vector<2x32xf32>,
    %c1_167 = arith.constant 1 : index
    %c0_168 = arith.constant 0 : index
    %c0_169 = arith.constant 0 : index
    %503 = vector.load %arg14[%c1_167, %c0_168, %c0_169] : memref<2x2x32xf32, #tpu.memory_space<vmem>>, vector<1x2x32xf32>
    %504 = vector.shape_cast %503 : vector<1x2x32xf32> to vector<2x32xf32>
    %505 = vector.shape_cast %501 : vector<2x32xf32> to vector<1x2x32xf32>
    tpu.vector_store %arg14[%c1_167, %c0_168, %c0_169], %505 {strides = array<i32>} : memref<2x2x32xf32, #tpu.memory_space<vmem>>, vector<1x2x32xf32>,
    %c1_170 = arith.constant 1 : index
    %c0_171 = arith.constant 0 : index
    %c0_172 = arith.constant 0 : index
    %506 = vector.load %arg15[%c1_170, %c0_171, %c0_172] : memref<2x2x32xf32, #tpu.memory_space<vmem>>, vector<1x2x32xf32>
    %507 = vector.shape_cast %506 : vector<1x2x32xf32> to vector<2x32xf32>
    %508 = vector.shape_cast %499 : vector<2x32xf32> to vector<1x2x32xf32>
    tpu.vector_store %arg15[%c1_170, %c0_171, %c0_172], %508 {strides = array<i32>} : memref<2x2x32xf32, #tpu.memory_space<vmem>>, vector<1x2x32xf32>,
    %c0_173 = arith.constant 0 : index
    %c0_174 = arith.constant 0 : index
    %509 = vector.load %arg17[%c0_173, %c0_174] : memref<16x32xf32, #tpu.memory_space<vmem>>, vector<16x32xf32>
    %cst_175 = arith.constant dense<0.000000e+00> : vector<16x16xf32>
    %510 = tpu.matmul %509, %8, %cst_175 {dimension_numbers = #tpu.dot_dimension_numbers<[1], [0], [0], [1], [0, 0, 1, 1], [], []>} : vector<16x32xf32>, vector<32x16xf32>, vector<16x16xf32> -> vector<16x16xf32>
    %511 = vector.broadcast %9 : vector<1x16xf32> to vector<16x16xf32>
    %512 = arith.addf %510, %511 : vector<16x16xf32>
    %513 = arith.negf %512 : vector<16x16xf32>
    %514 = math.exp %513 : vector<16x16xf32>
    %cst_176 = arith.constant 1.000000e+00 : f32
    %515 = vector.broadcast %cst_176 : f32 to vector<16x16xf32>
    %516 = arith.addf %515, %514 : vector<16x16xf32>
    %517 = arith.divf %515, %516 : vector<16x16xf32>
    %518 = arith.mulf %4, %517 : vector<16x16xf32>
    %519 = arith.addf %2, %518 : vector<16x16xf32>
    %c0_177 = arith.constant 0 : index
    %c0_178 = arith.constant 0 : index
    %520 = vector.load %arg13[%c0_177, %c0_178] : memref<16x16xf32, #tpu.memory_space<vmem>>, vector<16x16xf32>
    tpu.vector_store %arg13[%c0_177, %c0_178], %519 {strides = array<i32>} : memref<16x16xf32, #tpu.memory_space<vmem>>, vector<16x16xf32>,
    return
  }
}

</mosaic_0001>

<bundles_post_ra>
// kernel: lstm_concept_corrector_forward.1
= control target key start
LH: loop header
LB: loop body
LE: loop exit
PB: predicated region body
PF: predicated region fallthrough
CT: control target
= control target key end

     0   :  { %21 = vsyncpa [#allocation5], 0  ;;  %v2622_v6 = vmov 0.0   ;;  %vm2623_vm0 = vmmov 0   ;;  %s3133_s0 = inlined_call_operand.vmem [shape: f32[16,16], index: 0, kind: input, shape index: {}]   ;;  %s3134_s1 = inlined_call_operand.vmem [shape: f32[16,16], index: 1, kind: input, shape index: {}]   ;;  %s3135_s2 = inlined_call_operand.vmem [shape: f32[16,16], index: 2, kind: input, shape index: {}]   ;;  %s3136_s3 = inlined_call_operand.vmem [shape: f32[2,2,32], index: 3, kind: input, shape index: {}]   ;;  %s3137_s4 = inlined_call_operand.vmem [shape: f32[2,2,32], index: 4, kind: input, shape index: {}]   ;;  %s3138_s5 = inlined_call_operand.vmem [shape: f32[32,16], index: 5, kind: input, shape index: {}]   ;;  %s3139_s6 = inlined_call_operand.vmem [shape: f32[1,16], index: 6, kind: input, shape index: {}]   ;;  %s3140_s7 = inlined_call_operand.vmem [shape: f32[16,128], index: 7, kind: input, shape index: {}]   ;;  %s3141_s8 = inlined_call_operand.vmem [shape: f32[32,128], index: 8, kind: input, shape index: {}]   ;;  %s3142_s9 = inlined_call_operand.vmem [shape: f32[1,128], index: 9, kind: input, shape index: {}]   ;;  %s3143_s10 = inlined_call_operand.vmem [shape: f32[32,128], index: 10, kind: input, shape index: {}]   ;;  %s3144_s11 = inlined_call_operand.vmem [shape: f32[32,128], index: 11, kind: input, shape index: {}]   ;;  %s3145_s12 = inlined_call_operand.vmem [shape: f32[1,128], index: 12, kind: input, shape index: {}]   ;;  %s3146_s13 = inlined_call_operand.vmem [shape: f32[16,16], index: 13, kind: output, shape index: {0}]   ;;  %s3147_s14 = inlined_call_operand.hbm [shape: f32[2,2,32], index: 14, kind: output, shape index: {1}]   ;;  %s3148_s15 = inlined_call_operand.hbm [shape: f32[2,2,32], index: 15, kind: output, shape index: {2}]  }
   0x1   :  { %v69_v0 = vld [vmem:[%s3140_s7 + $0x8] sm:$0xff]  ;;  %v68_v1 = vld [vmem:[%s3140_s7] sm:$0xff]  ;;  %2236 = vmatprep.subr.mxu1 %v2622_v6  ;;  %v2746_v11 = vld [vmem:[%s3141_s8 + $0x18] sm:$0xff]  ;;  %2244 = vmatprep.mubr.msk.f32.mxu1 %vm2623_vm0, %v2622_v6 }
   0x2   :  { %v49_v2 = vld [vmem:[%s3133_s0] sm:$0xff]  ;;  %2229 = vmatprep.subr.mxu0 %v69_v0  ;;  %v50_v5 = vld [vmem:[%s3133_s0 + $0x8] sm:$0xff]  ;;  %2237 = vmatpush3.msra.mxu1 %v2746_v11  ;;  %v2758_v14 = vld [vmem:[%s3141_s8 + $0x10] sm:$0xff] }
   0x3   :  { %v2722_v3 = vld [vmem:[%s3134_s1] sm:$0xff]  ;;  %2230 = vmatpush3.msra.mxu0 %v69_v0  ;;  %v2738_v9 = vld [vmem:[%s3134_s1 + $0x8] sm:$0xff]  ;;  %2238 = vmatprep.subr.mxu1 %v2622_v6 }
   0x4   :  { %v57_v4 = vld [vmem:[%s3135_s2] sm:$0xff]  ;;  %v2732_v7 = vmul.f32 %v2722_v3, %v49_v2  ;;  %v55_v8 = vsub.f32 1.0, %v2722_v3  ;;  %v58_v10 = vld [vmem:[%s3135_s2 + $0x8] sm:$0xff]  ;;  %2231 = vmatprep.subr.mxu0 %v68_v1  ;;  %v2751_v12 = vmul.f32 %v2738_v9, %v50_v5  ;;  %v56_v13 = vsub.f32 1.0, %v2738_v9 }
   0x5   :  { %2232 = vmatpush3.msra.mxu0 %v68_v1  ;;  %v2766_v16 = vld [vmem:[%s3141_s8 + $0x8] sm:$0xff] }
   0x6   :  { %v59_v15 = vmul.f32 %v57_v4, %v55_v8 }
   0x7   :  { %22 = vsyncpa [#allocation7], 0  ;;  %vm81_vm1 = vcmask 130048   ;;  %v60_v17 = vmul.f32 %v58_v10, %v56_v13  ;;  %2239 = vmatpush3.msra.mxu1 %v2758_v14  ;;  %2247 = vmatprep.subr.mxu0 %v2622_v6  ;;  %v2777_v19 = vld [vmem:[%s3141_s8] sm:$0xff]  ;;  %vm168_vm2 = vcmask 261120   ;;  %s2624_s26 = smov 64  }
   0x8   :  { %v61_v18 = vadd.f32 %v59_v15, %v2732_v7  ;;  %2240 = vmatprep.subr.mxu1 %v2622_v6  ;;  %v165_v21 = vld [vmem:[%s3136_s3] sm:$0x3]  ;;  %vm275_vm3 = vcmask 254976   ;;  %s2628_s1 = smov [#allocation6]  }
   0x9   :  { %v62_v20 = vadd.f32 %v60_v17, %v2751_v12  ;;  %2241 = vmatpush3.msra.mxu1 %v2766_v16  ;;  %v2088_v22 = vld [vmem:[%s3142_s9] ss:$0 sm:$0xff]  ;;  %s2625_s9 = smov 32   ;;  %s2071_s19 = sshll.u32 %s2628_s1, 4  ;;  %s2072_s19 = int_to_ptr.vmem [resolvable:$true] %s2071_s19 }
   0xa   :  { %2233 = vmatprep.mubr.msk.f32.mxu0 %vm81_vm1, %v61_v18  ;;  %2242 = vmatprep.subr.mxu1 %v2622_v6  ;;  %v166_v32 = vld [vmem:[%s3137_s4] sm:$0x3] }
   0xb   :  { %2234 = vmatmul.mubr.msk.f32.vlgmr.msra.gmra.mxu0 %vm81_vm1, %v62_v20  ;;  %2243 = vmatpush3.msra.mxu1 %v2777_v19 }
   0xc   :  { %2245 = vmatmul.mubr.msk.f32.vlgmr.msra.gmra.mxu1 %vm168_vm2, %v165_v21  ;;  %2248 = vmatpush3.msra.mxu0 %v2746_v11 }
   0xd   :  { %2249 = vmatprep.subr.mxu0 %v2622_v6  ;;  %2255 = vmatprep.mubr.msk.f32.mxu0 %vm2623_vm0, %v2622_v6 }
   0xe   :  { %2250 = vmatpush3.msra.mxu0 %v2758_v14  ;;  %2258 = vmatprep.subr.mxu1 %v2622_v6 }
   0xf   :  { %2251 = vmatprep.subr.mxu0 %v2622_v6  ;;  %2259 = vmatpush3.msra.mxu1 %v2746_v11 }
  0x10   :  { %2252 = vmatpush3.msra.mxu0 %v2766_v16  ;;  %2260 = vmatprep.subr.mxu1 %v2622_v6 }
  0x11   :  { %2253 = vmatprep.subr.mxu0 %v2622_v6  ;;  %2261 = vmatpush3.msra.mxu1 %v2758_v14 }
  0x12   :  { %2254 = vmatpush3.msra.mxu0 %v2777_v19  ;;  %2262 = vmatprep.subr.mxu1 %v2622_v6 }
  0x13   :  { %2263 = vmatpush3.msra.mxu1 %v2766_v16  ;;  %2266 = vmatprep.mubr.msk.f32.mxu1 %vm2623_vm0, %v2622_v6 }
  0x14   :  { %2264 = vmatprep.subr.mxu1 %v2622_v6  ;;  %2269 = vmatprep.subr.mxu0 %v2622_v6 }
  0x15   :  { %2265 = vmatpush3.msra.mxu1 %v2777_v19 }
  0x16   :  { %2280 = vmatprep.subr.mxu1 %v2622_v6 }
  0xcb   :  { %v2235_v23 = vpop.f32.mrf.mxu0 }
  0xcc   :  { %v160_v24 = vadd.f32 %v2235_v23, %v2088_v22  ;;  %v238_v25 = vpop.f32.mrf.mxu1 }
  0xcd   :  { %v154_v26 = vpop.f32.mrf.mxu0 }
  0xce   :  { %164 = vst [vmem:[#allocation2 + $0x8] sm:$0xff] %v160_v24  ;;  %v155_v27 = vadd.f32 %v2088_v22, %v154_v26  ;;  %v2246_v28 = vpop.f32.mrf.mxu1 }
  0xd0   :  { %163 = vst [vmem:[#allocation2] sm:$0xff] %v155_v27 }
  0xd7   :  { %v167_v29 = vld [vmem:[#allocation2] sm:$0x3]  ;;  %v277_v47 = vld [vmem:[#allocation2 + $0x2] sm:$0x3]  ;;  %v380_v1 = vld [vmem:[#allocation2 + $0x4] sm:$0x3] }
  0xd8   :  { %v242_v30 = vadd.f32 %v238_v25, %v167_v29 }
  0xda   :  { %2442 = vtanh.f32 %v242_v30  ;;  %v2092_v33 = vmul.f32 -1.442695, %v242_v30  ;;  %v483_v30 = vld [vmem:[#allocation2 + $0x6] sm:$0x3] }
  0xdc   :  { %2444 = vpow2.f32 %v2092_v33 }
  0xe7   :  { %v2443_v31 = vpop.eup %2442 }
  0xe8   :  { %256 = vrot.lane.b32.xlu0 %v2443_v31, %s2624_s26 }
  0xe9   :  { %v2445_v34 = vpop.eup %2444 }
  0xea   :  { %v246_v35 = vadd.f32 1.0, %v2445_v34 }
  0xec   :  { %251 = vrot.lane.b32.xlu0 %v166_v32, %s2625_s9  ;;  %2446 = vrcp.f32 %v246_v35 }
  0xf9   :  { %v2447_v36 = vpop.eup %2446 }
 0x15a   :  { %v257_v37 = vpop.permute.xlu0 %256 }
 0x15b   :  { %v259_v38 = vmul.f32 %v2447_v36, %v257_v37 }
 0x15d   :  { %261 = vrot.lane.b32.xlu1 %v259_v38, %s2625_s9 }
 0x15e   :  { %v252_v39 = vpop.permute.xlu0 %251 }
 0x15f   :  { %v254_v40 = vmul.f32 %v2447_v36, %v252_v39 }
 0x1cf   :  { %v262_v41 = vpop.permute.xlu1 %261 }
 0x1d0   :  { %v264_v42 = vadd.f32 %v262_v41, %v254_v40 }
 0x1d2   :  { %2448 = vtanh.f32 %v264_v42 }
 0x1df   :  { %v2449_v43 = vpop.eup %2448 }
 0x1e0   :  { %267 = vrot.lane.b32.xlu1 %v2449_v43, %s2624_s26 }
 0x252   :  { %v268_v44 = vpop.permute.xlu1 %267 }
 0x253   :  { %v270_v45 = vmul.f32 %v2447_v36, %v268_v44 }
 0x255   :  { %272 = vrot.lane.b32.xlu0 %v270_v45, %s2625_s9 }
 0x2c7   :  { %v273_v46 = vpop.permute.xlu0 %272 }
 0x2c8   :  { %276 = vst.msk [vmem:[#allocation3] sm:$0x3] %vm275_vm3, %v273_v46  ;;  %2256 = vmatmul.mubr.msk.f32.vlgmr.msra.gmra.mxu0 %vm168_vm2, %v273_v46 }
 0x2c9   :  { %2270 = vmatpush3.msra.mxu0 %v2746_v11  ;;  %2277 = vmatprep.mubr.msk.f32.mxu0 %vm2623_vm0, %v2622_v6 }
 0x2ca   :  { %2271 = vmatprep.subr.mxu0 %v2622_v6 }
 0x2cb   :  { %2272 = vmatpush3.msra.mxu0 %v2758_v14 }
 0x2cc   :  { %2273 = vmatprep.subr.mxu0 %v2622_v6 }
 0x2cd   :  { %2274 = vmatpush3.msra.mxu0 %v2766_v16 }
 0x2ce   :  { %2275 = vmatprep.subr.mxu0 %v2622_v6 }
 0x2cf   :  { %2276 = vmatpush3.msra.mxu0 %v2777_v19 }
 0x2d0   :  { %2291 = vmatprep.subr.mxu0 %v2622_v6 }
 0x388   :  { %v346_v48 = vpop.f32.mrf.mxu0 }
 0x389   :  { %v350_v49 = vadd.f32 %v346_v48, %v277_v47  ;;  %v586_v48 = vld [vmem:[#allocation2 + $0x8] sm:$0x3] }
 0x38a   :  { %v2257_v50 = vpop.f32.mrf.mxu0 }
 0x38b   :  { %2450 = vtanh.f32 %v350_v49  ;;  %v2094_v52 = vmul.f32 -1.442695, %v350_v49 }
 0x38d   :  { %2452 = vpow2.f32 %v2094_v52 }
 0x398   :  { %v2451_v51 = vpop.eup %2450 }
 0x399   :  { %360 = vrot.lane.b32.xlu1 %v2451_v51, %s2624_s26 }
 0x39a   :  { %v2453_v53 = vpop.eup %2452 }
 0x39b   :  { %v354_v54 = vadd.f32 1.0, %v2453_v53 }
 0x39d   :  { %2454 = vrcp.f32 %v354_v54 }
 0x3aa   :  { %v2455_v55 = vpop.eup %2454 }
 0x3ab   :  { %v358_v58 = vmul.f32 %v2455_v55, %v264_v42 }
 0x40b   :  { %v361_v56 = vpop.permute.xlu1 %360 }
 0x40c   :  { %v363_v57 = vmul.f32 %v2455_v55, %v361_v56 }
 0x40e   :  { %365 = vrot.lane.b32.xlu0 %v363_v57, %s2625_s9 }
 0x480   :  { %v366_v59 = vpop.permute.xlu0 %365 }
 0x481   :  { %v368_v60 = vadd.f32 %v366_v59, %v358_v58 }
 0x483   :  { %2456 = vtanh.f32 %v368_v60 }
 0x490   :  { %v2457_v61 = vpop.eup %2456 }
 0x491   :  { %371 = vrot.lane.b32.xlu1 %v2457_v61, %s2624_s26 }
 0x503   :  { %v372_v62 = vpop.permute.xlu1 %371 }
 0x504   :  { %v374_v63 = vmul.f32 %v2455_v55, %v372_v62 }
 0x506   :  { %376 = vrot.lane.b32.xlu0 %v374_v63, %s2625_s9 }
 0x578   :  { %v377_v0 = vpop.permute.xlu0 %376 }
 0x579   :  { %379 = vst.msk [vmem:[#allocation3 + $0x2] sm:$0x3] %vm275_vm3, %v377_v0  ;;  %2267 = vmatmul.mubr.msk.f32.vlgmr.msra.gmra.mxu1 %vm168_vm2, %v377_v0 }
 0x57a   :  { %2281 = vmatpush3.msra.mxu1 %v2746_v11  ;;  %2288 = vmatprep.mubr.msk.f32.mxu1 %vm2623_vm0, %v2622_v6 }
 0x57b   :  { %2282 = vmatprep.subr.mxu1 %v2622_v6 }
 0x57c   :  { %2283 = vmatpush3.msra.mxu1 %v2758_v14 }
 0x57d   :  { %2284 = vmatprep.subr.mxu1 %v2622_v6 }
 0x57e   :  { %2285 = vmatpush3.msra.mxu1 %v2766_v16 }
 0x57f   :  { %2286 = vmatprep.subr.mxu1 %v2622_v6 }
 0x580   :  { %2287 = vmatpush3.msra.mxu1 %v2777_v19 }
 0x581   :  { %2302 = vmatprep.subr.mxu1 %v2622_v6 }
 0x639   :  { %v449_v2 = vpop.f32.mrf.mxu1 }
 0x63a   :  { %v453_v4 = vadd.f32 %v449_v2, %v380_v1  ;;  %v689_v2 = vld [vmem:[#allocation2 + $0xa] sm:$0x3] }
 0x63b   :  { %v2268_v5 = vpop.f32.mrf.mxu1 }
 0x63c   :  { %2458 = vtanh.f32 %v453_v4  ;;  %v2096_v15 = vmul.f32 -1.442695, %v453_v4 }
 0x63e   :  { %2460 = vpow2.f32 %v2096_v15 }
 0x649   :  { %v2459_v10 = vpop.eup %2458 }
 0x64a   :  { %463 = vrot.lane.b32.xlu1 %v2459_v10, %s2624_s26 }
 0x64b   :  { %v2461_v17 = vpop.eup %2460 }
 0x64c   :  { %v457_v18 = vadd.f32 1.0, %v2461_v17 }
 0x64e   :  { %2462 = vrcp.f32 %v457_v18 }
 0x65b   :  { %v2463_v20 = vpop.eup %2462 }
 0x65c   :  { %v461_v23 = vmul.f32 %v2463_v20, %v368_v60 }
 0x6bc   :  { %v464_v21 = vpop.permute.xlu1 %463 }
 0x6bd   :  { %v466_v22 = vmul.f32 %v2463_v20, %v464_v21 }
 0x6bf   :  { %468 = vrot.lane.b32.xlu0 %v466_v22, %s2625_s9 }
 0x731   :  { %v469_v24 = vpop.permute.xlu0 %468 }
 0x732   :  { %v471_v25 = vadd.f32 %v469_v24, %v461_v23 }
 0x734   :  { %2464 = vtanh.f32 %v471_v25 }
 0x741   :  { %v2465_v26 = vpop.eup %2464 }
 0x742   :  { %474 = vrot.lane.b32.xlu1 %v2465_v26, %s2624_s26 }
 0x7b4   :  { %v475_v27 = vpop.permute.xlu1 %474 }
 0x7b5   :  { %v477_v28 = vmul.f32 %v2463_v20, %v475_v27 }
 0x7b7   :  { %479 = vrot.lane.b32.xlu0 %v477_v28, %s2625_s9  ;;  %v792_v28 = vld [vmem:[#allocation2 + $0xc] sm:$0x3] }
 0x829   :  { %v480_v29 = vpop.permute.xlu0 %479 }
 0x82a   :  { %482 = vst.msk [vmem:[#allocation3 + $0x4] sm:$0x3] %vm275_vm3, %v480_v29  ;;  %2278 = vmatmul.mubr.msk.f32.vlgmr.msra.gmra.mxu0 %vm168_vm2, %v480_v29 }
 0x82b   :  { %2292 = vmatpush3.msra.mxu0 %v2746_v11  ;;  %2299 = vmatprep.mubr.msk.f32.mxu0 %vm2623_vm0, %v2622_v6 }
 0x82c   :  { %2293 = vmatprep.subr.mxu0 %v2622_v6 }
 0x82d   :  { %2294 = vmatpush3.msra.mxu0 %v2758_v14 }
 0x82e   :  { %2295 = vmatprep.subr.mxu0 %v2622_v6 }
 0x82f   :  { %2296 = vmatpush3.msra.mxu0 %v2766_v16 }
 0x830   :  { %2297 = vmatprep.subr.mxu0 %v2622_v6 }
 0x831   :  { %2298 = vmatpush3.msra.mxu0 %v2777_v19 }
 0x832   :  { %2313 = vmatprep.subr.mxu0 %v2622_v6 }
 0x8ea   :  { %v552_v31 = vpop.f32.mrf.mxu0 }
 0x8eb   :  { %v556_v32 = vadd.f32 %v552_v31, %v483_v30 }
 0x8ec   :  { %v2279_v33 = vpop.f32.mrf.mxu0 }
 0x8ed   :  { %2466 = vtanh.f32 %v556_v32  ;;  %v2098_v35 = vmul.f32 -1.442695, %v556_v32 }
 0x8ef   :  { %2468 = vpow2.f32 %v2098_v35 }
 0x8fa   :  { %v2467_v34 = vpop.eup %2466 }
 0x8fb   :  { %566 = vrot.lane.b32.xlu1 %v2467_v34, %s2624_s26 }
 0x8fc   :  { %v2469_v36 = vpop.eup %2468 }
 0x8fd   :  { %v560_v37 = vadd.f32 1.0, %v2469_v36 }
 0x8ff   :  { %2470 = vrcp.f32 %v560_v37 }
 0x90c   :  { %v2471_v38 = vpop.eup %2470 }
 0x90d   :  { %v564_v41 = vmul.f32 %v2471_v38, %v471_v25 }
 0x96d   :  { %v567_v39 = vpop.permute.xlu1 %566 }
 0x96e   :  { %v569_v40 = vmul.f32 %v2471_v38, %v567_v39 }
 0x970   :  { %571 = vrot.lane.b32.xlu0 %v569_v40, %s2625_s9 }
 0x9e2   :  { %v572_v42 = vpop.permute.xlu0 %571 }
 0x9e3   :  { %v574_v43 = vadd.f32 %v572_v42, %v564_v41 }
 0x9e5   :  { %2472 = vtanh.f32 %v574_v43 }
 0x9f2   :  { %v2473_v44 = vpop.eup %2472 }
 0x9f3   :  { %577 = vrot.lane.b32.xlu1 %v2473_v44, %s2624_s26 }
 0xa65   :  { %v578_v45 = vpop.permute.xlu1 %577 }
 0xa66   :  { %v580_v46 = vmul.f32 %v2471_v38, %v578_v45 }
 0xa68   :  { %582 = vrot.lane.b32.xlu0 %v580_v46, %s2625_s9  ;;  %v895_v46 = vld [vmem:[#allocation2 + $0xe] sm:$0x3] }
 0xada   :  { %v583_v47 = vpop.permute.xlu0 %582 }
 0xadb   :  { %585 = vst.msk [vmem:[#allocation3 + $0x6] sm:$0x3] %vm275_vm3, %v583_v47  ;;  %2289 = vmatmul.mubr.msk.f32.vlgmr.msra.gmra.mxu1 %vm168_vm2, %v583_v47 }
 0xadc   :  { %2303 = vmatpush3.msra.mxu1 %v2746_v11  ;;  %2310 = vmatprep.mubr.msk.f32.mxu1 %vm2623_vm0, %v2622_v6 }
 0xadd   :  { %2304 = vmatprep.subr.mxu1 %v2622_v6 }
 0xade   :  { %2305 = vmatpush3.msra.mxu1 %v2758_v14 }
 0xadf   :  { %2306 = vmatprep.subr.mxu1 %v2622_v6 }
 0xae0   :  { %2307 = vmatpush3.msra.mxu1 %v2766_v16 }
 0xae1   :  { %2308 = vmatprep.subr.mxu1 %v2622_v6 }
 0xae2   :  { %2309 = vmatpush3.msra.mxu1 %v2777_v19  ;;  %v1004_v27 = vld [vmem:[#allocation3] sm:$0xff] }
 0xb9b   :  { %v655_v49 = vpop.f32.mrf.mxu1 }
 0xb9c   :  { %v659_v50 = vadd.f32 %v655_v49, %v586_v48 }
 0xb9d   :  { %v2290_v51 = vpop.f32.mrf.mxu1 }
 0xb9e   :  { %2474 = vtanh.f32 %v659_v50  ;;  %v2100_v53 = vmul.f32 -1.442695, %v659_v50 }
 0xba0   :  { %2476 = vpow2.f32 %v2100_v53 }
 0xbab   :  { %v2475_v52 = vpop.eup %2474 }
 0xbac   :  { %669 = vrot.lane.b32.xlu1 %v2475_v52, %s2624_s26 }
 0xbad   :  { %v2477_v54 = vpop.eup %2476 }
 0xbae   :  { %v663_v55 = vadd.f32 1.0, %v2477_v54 }
 0xbb0   :  { %2478 = vrcp.f32 %v663_v55 }
 0xbbd   :  { %v2479_v56 = vpop.eup %2478 }
 0xbbe   :  { %v667_v59 = vmul.f32 %v2479_v56, %v574_v43 }
 0xc1e   :  { %v670_v57 = vpop.permute.xlu1 %669 }
 0xc1f   :  { %v672_v58 = vmul.f32 %v2479_v56, %v670_v57 }
 0xc21   :  { %674 = vrot.lane.b32.xlu0 %v672_v58, %s2625_s9 }
 0xc93   :  { %v675_v60 = vpop.permute.xlu0 %674 }
 0xc94   :  { %v677_v61 = vadd.f32 %v675_v60, %v667_v59 }
 0xc96   :  { %2480 = vtanh.f32 %v677_v61 }
 0xca3   :  { %v2481_v62 = vpop.eup %2480 }
 0xca4   :  { %680 = vrot.lane.b32.xlu1 %v2481_v62, %s2624_s26  ;;  %v1008_v62 = vld [vmem:[%s3143_s10 + $0x10] sm:$0xff] }
 0xd16   :  { %v681_v63 = vpop.permute.xlu1 %680 }
 0xd17   :  { %v683_v0 = vmul.f32 %v2479_v56, %v681_v63  ;;  %v1007_v63 = vld [vmem:[%s3143_s10 + $0x8] sm:$0xff] }
 0xd19   :  { %685 = vrot.lane.b32.xlu0 %v683_v0, %s2625_s9  ;;  %v1006_v0 = vld [vmem:[%s3143_s10] sm:$0xff] }
 0xd8b   :  { %v686_v1 = vpop.permute.xlu0 %685 }
 0xd8c   :  { %688 = vst.msk [vmem:[#allocation3 + $0x8] sm:$0x3] %vm275_vm3, %v686_v1  ;;  %2300 = vmatmul.mubr.msk.f32.vlgmr.msra.gmra.mxu0 %vm168_vm2, %v686_v1  ;;  %v2932_v1 = vld [vmem:[%s3144_s11 + $0x18] sm:$0xff] }
 0xd8d   :  { %2314 = vmatpush3.msra.mxu0 %v2746_v11  ;;  %2321 = vmatprep.mubr.msk.f32.mxu0 %vm2623_vm0, %v2622_v6 }
 0xd8e   :  { %2315 = vmatprep.subr.mxu0 %v2622_v6 }
 0xd8f   :  { %2316 = vmatpush3.msra.mxu0 %v2758_v14 }
 0xd90   :  { %2317 = vmatprep.subr.mxu0 %v2622_v6 }
 0xd91   :  { %2318 = vmatpush3.msra.mxu0 %v2766_v16 }
 0xd92   :  { %2319 = vmatprep.subr.mxu0 %v2622_v6 }
 0xd93   :  { %2320 = vmatpush3.msra.mxu0 %v2777_v19 }
 0xd94   :  { %2335 = vmatprep.subr.mxu0 %v2622_v6 }
 0xe4c   :  { %v758_v4 = vpop.f32.mrf.mxu0 }
 0xe4d   :  { %v762_v11 = vadd.f32 %v758_v4, %v689_v2  ;;  %v2937_v2 = vld [vmem:[%s3144_s11 + $0x10] sm:$0xff] }
 0xe4e   :  { %v2301_v5 = vpop.f32.mrf.mxu0 }
 0xe4f   :  { %2482 = vtanh.f32 %v762_v11  ;;  %v2102_v15 = vmul.f32 -1.442695, %v762_v11  ;;  %v2945_v11 = vld [vmem:[%s3144_s11 + $0x8] sm:$0xff] }
 0xe51   :  { %2484 = vpow2.f32 %v2102_v15  ;;  %v2110_v15 = vld [vmem:[%s3136_s3 + $0x2] sm:$0x3] }
 0xe5c   :  { %v2483_v10 = vpop.eup %2482 }
 0xe5d   :  { %772 = vrot.lane.b32.xlu1 %v2483_v10, %s2624_s26  ;;  %v2952_v10 = vld [vmem:[%s3144_s11] sm:$0xff]  ;;  %s2626_s11 = smov 96  }
 0xe5e   :  { %v2485_v14 = vpop.eup %2484 }
 0xe5f   :  { %v766_v17 = vadd.f32 1.0, %v2485_v14  ;;  %v2111_v14 = vld [vmem:[%s3137_s4 + $0x2] sm:$0x3] }
 0xe61   :  { %2486 = vrcp.f32 %v766_v17 }
 0xe6e   :  { %v2487_v16 = vpop.eup %2486 }
 0xe6f   :  { %v770_v19 = vmul.f32 %v2487_v16, %v677_v61  ;;  %v1009_v61 = vld [vmem:[%s3143_s10 + $0x18] sm:$0xff] }
 0xe70   :  { %2324 = vmatprep.subr.mxu1 %v1009_v61 }
 0xecf   :  { %v773_v18 = vpop.permute.xlu1 %772 }
 0xed0   :  { %v775_v20 = vmul.f32 %v2487_v16, %v773_v18 }
 0xed2   :  { %777 = vrot.lane.b32.xlu0 %v775_v20, %s2625_s9 }
 0xf44   :  { %v778_v21 = vpop.permute.xlu0 %777 }
 0xf45   :  { %v780_v22 = vadd.f32 %v778_v21, %v770_v19  ;;  %v2107_v19 = vld [vmem:[%s3145_s12] ss:$0 sm:$0xff] }
 0xf47   :  { %2488 = vtanh.f32 %v780_v22 }
 0xf54   :  { %v2489_v23 = vpop.eup %2488 }
 0xf55   :  { %783 = vrot.lane.b32.xlu1 %v2489_v23, %s2624_s26 }
 0xfc7   :  { %v784_v24 = vpop.permute.xlu1 %783 }
 0xfc8   :  { %v786_v25 = vmul.f32 %v2487_v16, %v784_v24 }
 0xfca   :  { %788 = vrot.lane.b32.xlu0 %v786_v25, %s2625_s9 }
0x103c   :  { %v789_v26 = vpop.permute.xlu0 %788 }
0x103d   :  { %791 = vst.msk [vmem:[#allocation3 + $0xa] sm:$0x3] %vm275_vm3, %v789_v26  ;;  %2311 = vmatmul.mubr.msk.f32.vlgmr.msra.gmra.mxu1 %vm168_vm2, %v789_v26 }
0x103e   :  { %2332 = vmatprep.mubr.msk.f32.mxu1 %vm168_vm2, %v1004_v27  ;;  %2325 = vmatpush3.msra.mxu1 %v1009_v61 }
0x103f   :  { %2326 = vmatprep.subr.mxu1 %v1008_v62 }
0x1040   :  { %2327 = vmatpush3.msra.mxu1 %v1008_v62 }
0x1041   :  { %2328 = vmatprep.subr.mxu1 %v1007_v63 }
0x1042   :  { %2329 = vmatpush3.msra.mxu1 %v1007_v63 }
0x1043   :  { %2330 = vmatprep.subr.mxu1 %v1006_v0 }
0x1044   :  { %2331 = vmatpush3.msra.mxu1 %v1006_v0 }
0x1045   :  { %2346 = vmatprep.subr.mxu1 %v2622_v6 }
0x10fd   :  { %v861_v29 = vpop.f32.mrf.mxu1 }
0x10fe   :  { %v865_v30 = vadd.f32 %v861_v29, %v792_v28 }
0x10ff   :  { %v2312_v31 = vpop.f32.mrf.mxu1 }
0x1100   :  { %2490 = vtanh.f32 %v865_v30  ;;  %v2104_v33 = vmul.f32 -1.442695, %v865_v30 }
0x1102   :  { %2492 = vpow2.f32 %v2104_v33 }
0x110d   :  { %v2491_v32 = vpop.eup %2490 }
0x110e   :  { %875 = vrot.lane.b32.xlu1 %v2491_v32, %s2624_s26 }
0x110f   :  { %v2493_v34 = vpop.eup %2492 }
0x1110   :  { %v869_v35 = vadd.f32 1.0, %v2493_v34 }
0x1112   :  { %2494 = vrcp.f32 %v869_v35 }
0x111f   :  { %v2495_v36 = vpop.eup %2494 }
0x1120   :  { %v873_v39 = vmul.f32 %v2495_v36, %v780_v22 }
0x1180   :  { %v876_v37 = vpop.permute.xlu1 %875 }
0x1181   :  { %v878_v38 = vmul.f32 %v2495_v36, %v876_v37 }
0x1183   :  { %880 = vrot.lane.b32.xlu0 %v878_v38, %s2625_s9 }
0x11f5   :  { %v881_v40 = vpop.permute.xlu0 %880 }
0x11f6   :  { %v883_v41 = vadd.f32 %v881_v40, %v873_v39 }
0x11f8   :  { %2496 = vtanh.f32 %v883_v41 }
0x1205   :  { %v2497_v42 = vpop.eup %2496 }
0x1206   :  { %886 = vrot.lane.b32.xlu1 %v2497_v42, %s2624_s26 }
0x1278   :  { %v887_v43 = vpop.permute.xlu1 %886 }
0x1279   :  { %v889_v44 = vmul.f32 %v2495_v36, %v887_v43 }
0x127b   :  { %891 = vrot.lane.b32.xlu0 %v889_v44, %s2625_s9 }
0x12ed   :  { %v892_v45 = vpop.permute.xlu0 %891 }
0x12ee   :  { %894 = vst.msk [vmem:[#allocation3 + $0xc] sm:$0x3] %vm275_vm3, %v892_v45  ;;  %2322 = vmatmul.mubr.msk.f32.vlgmr.msra.gmra.mxu0 %vm168_vm2, %v892_v45 }
0x12ef   :  { %2343 = vmatprep.mubr.msk.f32.mxu0 %vm2623_vm0, %v2622_v6  ;;  %2336 = vmatpush3.msra.mxu0 %v2932_v1 }
0x12f0   :  { %2337 = vmatprep.subr.mxu0 %v2622_v6 }
0x12f1   :  { %2338 = vmatpush3.msra.mxu0 %v2937_v2 }
0x12f2   :  { %2339 = vmatprep.subr.mxu0 %v2622_v6 }
0x12f3   :  { %2340 = vmatpush3.msra.mxu0 %v2945_v11 }
0x12f4   :  { %2341 = vmatprep.subr.mxu0 %v2622_v6 }
0x12f5   :  { %2342 = vmatpush3.msra.mxu0 %v2952_v10 }
0x12f6   :  { %2344 = vmatmul.mubr.msk.f32.vlgmr.msra.gmra.mxu0 %vm168_vm2, %v2110_v15  ;;  %2357 = vmatprep.subr.mxu0 %v2622_v6 }
0x12f7   :  { %2358 = vmatpush3.msra.mxu0 %v2932_v1  ;;  %2365 = vmatprep.mubr.msk.f32.mxu0 %vm2623_vm0, %v2622_v6 }
0x12f8   :  { %2359 = vmatprep.subr.mxu0 %v2622_v6 }
0x12f9   :  { %2360 = vmatpush3.msra.mxu0 %v2937_v2 }
0x12fa   :  { %2361 = vmatprep.subr.mxu0 %v2622_v6 }
0x12fb   :  { %2362 = vmatpush3.msra.mxu0 %v2945_v11 }
0x12fc   :  { %2363 = vmatprep.subr.mxu0 %v2622_v6 }
0x12fd   :  { %2364 = vmatpush3.msra.mxu0 %v2952_v10 }
0x12fe   :  { %2379 = vmatprep.subr.mxu0 %v2622_v6 }
0x13ae   :  { %v964_v47 = vpop.f32.mrf.mxu0 }
0x13af   :  { %v968_v48 = vadd.f32 %v964_v47, %v895_v46 }
0x13b0   :  { %v2323_v49 = vpop.f32.mrf.mxu0 }
0x13b1   :  { %2498 = vtanh.f32 %v968_v48  ;;  %v2106_v51 = vmul.f32 -1.442695, %v968_v48 }
0x13b3   :  { %2500 = vpow2.f32 %v2106_v51 }
0x13b6   :  { %v1178_v18 = vpop.f32.mrf.mxu0 }
0x13b8   :  { %v2345_v20 = vpop.f32.mrf.mxu0 }
0x13be   :  { %v2499_v50 = vpop.eup %2498 }
0x13bf   :  { %978 = vrot.lane.b32.xlu1 %v2499_v50, %s2624_s26 }
0x13c0   :  { %v2501_v52 = vpop.eup %2500 }
0x13c1   :  { %v972_v53 = vadd.f32 1.0, %v2501_v52 }
0x13c3   :  { %2502 = vrcp.f32 %v972_v53 }
0x13d0   :  { %v2503_v54 = vpop.eup %2502 }
0x13d1   :  { %v976_v57 = vmul.f32 %v2503_v54, %v883_v41 }
0x1431   :  { %v979_v55 = vpop.permute.xlu1 %978 }
0x1432   :  { %v981_v56 = vmul.f32 %v2503_v54, %v979_v55 }
0x1434   :  { %983 = vrot.lane.b32.xlu0 %v981_v56, %s2625_s9 }
0x14a6   :  { %v984_v58 = vpop.permute.xlu0 %983 }
0x14a7   :  { %v2913_v59 = vadd.f32 %v984_v58, %v976_v57 }
0x14a9   :  { %2504 = vtanh.f32 %v2913_v59 }
0x14b6   :  { %v2505_v60 = vpop.eup %2504 }
0x14b7   :  { %989 = vrot.lane.b32.xlu1 %v2505_v60, %s2624_s26 }
0x1529   :  { %v990_v4 = vpop.permute.xlu1 %989 }
0x152a   :  { %v992_v5 = vmul.f32 %v2503_v54, %v990_v4 }
0x152c   :  { %994 = vrot.lane.b32.xlu0 %v992_v5, %s2625_s9 }
0x1530   :  { %1191 = vrot.lane.b32.xlu0 %v2111_v14, %s2625_s9 }
0x159e   :  { %v995_v17 = vpop.permute.xlu0 %994 }
0x159f   :  { %997 = vst.msk [vmem:[#allocation3 + $0xe] sm:$0x3] %vm275_vm3, %v995_v17  ;;  %998 = vst.msk [vmem:[#allocation4] sm:$0x3] %vm275_vm3, %v995_v17 }
0x15a2   :  { %v1192_v34 = vpop.permute.xlu0 %1191 }
0x15a6   :  { %v1005_v16 = vld [vmem:[#allocation3 + $0x8] sm:$0xff] }
0x15a7   :  { %2333 = vmatmul.mubr.msk.f32.vlgmr.msra.gmra.mxu1 %vm168_vm2, %v1005_v16 }
0x15a8   :  { %2347 = vmatpush3.msra.mxu1 %v2932_v1  ;;  %2354 = vmatprep.mubr.msk.f32.mxu1 %vm2623_vm0, %v2622_v6 }
0x15a9   :  { %2348 = vmatprep.subr.mxu1 %v2622_v6 }
0x15aa   :  { %2349 = vmatpush3.msra.mxu1 %v2937_v2 }
0x15ab   :  { %2350 = vmatprep.subr.mxu1 %v2622_v6 }
0x15ac   :  { %2351 = vmatpush3.msra.mxu1 %v2945_v11 }
0x15ad   :  { %2352 = vmatprep.subr.mxu1 %v2622_v6 }
0x15ae   :  { %2353 = vmatpush3.msra.mxu1 %v2952_v10 }
0x15af   :  { %2368 = vmatprep.subr.mxu1 %v2622_v6 }
0x1667   :  { %v2334_v21 = vpop.f32.mrf.mxu1 }
0x1668   :  { %v1099_v22 = vadd.f32 %v2334_v21, %v2107_v19 }
0x1669   :  { %v1093_v23 = vpop.f32.mrf.mxu1 }
0x166a   :  { %1103 = vst [vmem:[#allocation2 + $0x8] sm:$0xff] %v1099_v22  ;;  %v1094_v24 = vadd.f32 %v2107_v19, %v1093_v23 }
0x166c   :  { %1102 = vst [vmem:[#allocation2] sm:$0xff] %v1094_v24 }
0x1673   :  { %v1108_v25 = vld [vmem:[#allocation2] sm:$0x3]  ;;  %v1216_v42 = vld [vmem:[#allocation2 + $0x2] sm:$0x3]  ;;  %v1319_v61 = vld [vmem:[#allocation2 + $0x4] sm:$0x3] }
0x1674   :  { %v1182_v26 = vadd.f32 %v1178_v18, %v1108_v25 }
0x1676   :  { %2506 = vtanh.f32 %v1182_v26  ;;  %v2113_v28 = vmul.f32 -1.442695, %v1182_v26  ;;  %v1422_v26 = vld [vmem:[#allocation2 + $0x6] sm:$0x3] }
0x1678   :  { %2508 = vpow2.f32 %v2113_v28 }
0x1683   :  { %v2507_v27 = vpop.eup %2506 }
0x1684   :  { %1196 = vrot.lane.b32.xlu1 %v2507_v27, %s2624_s26 }
0x1685   :  { %v2509_v29 = vpop.eup %2508 }
0x1686   :  { %v1186_v30 = vadd.f32 1.0, %v2509_v29 }
0x1688   :  { %2510 = vrcp.f32 %v1186_v30 }
0x1695   :  { %v2511_v31 = vpop.eup %2510 }
0x1696   :  { %v1194_v35 = vmul.f32 %v2511_v31, %v1192_v34 }
0x16f6   :  { %v1197_v32 = vpop.permute.xlu1 %1196 }
0x16f7   :  { %v1199_v33 = vmul.f32 %v2511_v31, %v1197_v32 }
0x16f9   :  { %1201 = vrot.lane.b32.xlu1 %v1199_v33, %s2625_s9 }
0x176b   :  { %v1202_v36 = vpop.permute.xlu1 %1201 }
0x176c   :  { %v1204_v37 = vadd.f32 %v1202_v36, %v1194_v35 }
0x176e   :  { %2512 = vtanh.f32 %v1204_v37 }
0x177b   :  { %v2513_v38 = vpop.eup %2512 }
0x177c   :  { %1207 = vrot.lane.b32.xlu0 %v2513_v38, %s2624_s26 }
0x17ee   :  { %v1208_v39 = vpop.permute.xlu0 %1207 }
0x17ef   :  { %v1210_v40 = vmul.f32 %v2511_v31, %v1208_v39 }
0x17f1   :  { %1212 = vrot.lane.b32.xlu1 %v1210_v40, %s2625_s9 }
0x1863   :  { %v1213_v41 = vpop.permute.xlu1 %1212 }
0x1864   :  { %1215 = vst.msk [vmem:[#allocation3] sm:$0x3] %vm275_vm3, %v1213_v41  ;;  %2355 = vmatmul.mubr.msk.f32.vlgmr.msra.gmra.mxu1 %vm168_vm2, %v1213_v41 }
0x1865   :  { %2369 = vmatpush3.msra.mxu1 %v2932_v1  ;;  %2376 = vmatprep.mubr.msk.f32.mxu1 %vm2623_vm0, %v2622_v6 }
0x1866   :  { %2370 = vmatprep.subr.mxu1 %v2622_v6 }
0x1867   :  { %2371 = vmatpush3.msra.mxu1 %v2937_v2 }
0x1868   :  { %2372 = vmatprep.subr.mxu1 %v2622_v6 }
0x1869   :  { %2373 = vmatpush3.msra.mxu1 %v2945_v11 }
0x186a   :  { %2374 = vmatprep.subr.mxu1 %v2622_v6 }
0x186b   :  { %2375 = vmatpush3.msra.mxu1 %v2952_v10 }
0x186c   :  { %2390 = vmatprep.subr.mxu1 %v2622_v6 }
0x1924   :  { %v1285_v43 = vpop.f32.mrf.mxu1 }
0x1925   :  { %v1289_v44 = vadd.f32 %v1285_v43, %v1216_v42 }
0x1926   :  { %v2356_v45 = vpop.f32.mrf.mxu1 }
0x1927   :  { %2514 = vtanh.f32 %v1289_v44  ;;  %v2115_v47 = vmul.f32 -1.442695, %v1289_v44  ;;  %v1525_v44 = vld [vmem:[#allocation2 + $0x8] sm:$0x3] }
0x1929   :  { %2516 = vpow2.f32 %v2115_v47 }
0x1934   :  { %v2515_v46 = vpop.eup %2514 }
0x1935   :  { %1299 = vrot.lane.b32.xlu0 %v2515_v46, %s2624_s26 }
0x1936   :  { %v2517_v48 = vpop.eup %2516 }
0x1937   :  { %v1293_v49 = vadd.f32 1.0, %v2517_v48 }
0x1939   :  { %2518 = vrcp.f32 %v1293_v49 }
0x1946   :  { %v2519_v50 = vpop.eup %2518 }
0x1947   :  { %v1297_v53 = vmul.f32 %v2519_v50, %v1204_v37 }
0x19a7   :  { %v1300_v51 = vpop.permute.xlu0 %1299 }
0x19a8   :  { %v1302_v52 = vmul.f32 %v2519_v50, %v1300_v51 }
0x19aa   :  { %1304 = vrot.lane.b32.xlu1 %v1302_v52, %s2625_s9 }
0x1a1c   :  { %v1305_v54 = vpop.permute.xlu1 %1304 }
0x1a1d   :  { %v1307_v55 = vadd.f32 %v1305_v54, %v1297_v53 }
0x1a1f   :  { %2520 = vtanh.f32 %v1307_v55 }
0x1a2c   :  { %v2521_v56 = vpop.eup %2520 }
0x1a2d   :  { %1310 = vrot.lane.b32.xlu0 %v2521_v56, %s2624_s26 }
0x1a9f   :  { %v1311_v57 = vpop.permute.xlu0 %1310 }
0x1aa0   :  { %v1313_v58 = vmul.f32 %v2519_v50, %v1311_v57 }
0x1aa2   :  { %1315 = vrot.lane.b32.xlu1 %v1313_v58, %s2625_s9 }
0x1b14   :  { %v1316_v60 = vpop.permute.xlu1 %1315 }
0x1b15   :  { %1318 = vst.msk [vmem:[#allocation3 + $0x2] sm:$0x3] %vm275_vm3, %v1316_v60  ;;  %2366 = vmatmul.mubr.msk.f32.vlgmr.msra.gmra.mxu0 %vm168_vm2, %v1316_v60 }
0x1b16   :  { %2380 = vmatpush3.msra.mxu0 %v2932_v1  ;;  %2387 = vmatprep.mubr.msk.f32.mxu0 %vm2623_vm0, %v2622_v6 }
0x1b17   :  { %2381 = vmatprep.subr.mxu0 %v2622_v6 }
0x1b18   :  { %2382 = vmatpush3.msra.mxu0 %v2937_v2 }
0x1b19   :  { %2383 = vmatprep.subr.mxu0 %v2622_v6 }
0x1b1a   :  { %2384 = vmatpush3.msra.mxu0 %v2945_v11 }
0x1b1b   :  { %2385 = vmatprep.subr.mxu0 %v2622_v6 }
0x1b1c   :  { %2386 = vmatpush3.msra.mxu0 %v2952_v10 }
0x1b1d   :  { %2401 = vmatprep.subr.mxu0 %v2622_v6 }
0x1bd5   :  { %v1388_v62 = vpop.f32.mrf.mxu0 }
0x1bd6   :  { %v1392_v63 = vadd.f32 %v1388_v62, %v1319_v61 }
0x1bd7   :  { %v2367_v0 = vpop.f32.mrf.mxu0 }
0x1bd8   :  { %2522 = vtanh.f32 %v1392_v63  ;;  %v2117_v5 = vmul.f32 -1.442695, %v1392_v63  ;;  %v1628_v63 = vld [vmem:[#allocation2 + $0xa] sm:$0x3] }
0x1bda   :  { %2524 = vpow2.f32 %v2117_v5 }
0x1be5   :  { %v2523_v4 = vpop.eup %2522 }
0x1be6   :  { %1402 = vrot.lane.b32.xlu0 %v2523_v4, %s2624_s26 }
0x1be7   :  { %v2525_v15 = vpop.eup %2524 }
0x1be8   :  { %v1396_v14 = vadd.f32 1.0, %v2525_v15 }
0x1bea   :  { %2526 = vrcp.f32 %v1396_v14 }
0x1bf7   :  { %v2527_v17 = vpop.eup %2526 }
0x1bf8   :  { %v1400_v20 = vmul.f32 %v2527_v17, %v1307_v55 }
0x1c58   :  { %v1403_v16 = vpop.permute.xlu0 %1402 }
0x1c59   :  { %v1405_v18 = vmul.f32 %v2527_v17, %v1403_v16 }
0x1c5b   :  { %1407 = vrot.lane.b32.xlu1 %v1405_v18, %s2625_s9 }
0x1ccd   :  { %v1408_v19 = vpop.permute.xlu1 %1407 }
0x1cce   :  { %v1410_v21 = vadd.f32 %v1408_v19, %v1400_v20 }
0x1cd0   :  { %2528 = vtanh.f32 %v1410_v21 }
0x1cdd   :  { %v2529_v22 = vpop.eup %2528 }
0x1cde   :  { %1413 = vrot.lane.b32.xlu0 %v2529_v22, %s2624_s26 }
0x1d50   :  { %v1414_v23 = vpop.permute.xlu0 %1413 }
0x1d51   :  { %v1416_v24 = vmul.f32 %v2527_v17, %v1414_v23 }
0x1d53   :  { %1418 = vrot.lane.b32.xlu1 %v1416_v24, %s2625_s9  ;;  %v1731_v24 = vld [vmem:[#allocation2 + $0xc] sm:$0x3] }
0x1dc5   :  { %v1419_v25 = vpop.permute.xlu1 %1418 }
0x1dc6   :  { %1421 = vst.msk [vmem:[#allocation3 + $0x4] sm:$0x3] %vm275_vm3, %v1419_v25  ;;  %2377 = vmatmul.mubr.msk.f32.vlgmr.msra.gmra.mxu1 %vm168_vm2, %v1419_v25 }
0x1dc7   :  { %2391 = vmatpush3.msra.mxu1 %v2932_v1  ;;  %2398 = vmatprep.mubr.msk.f32.mxu1 %vm2623_vm0, %v2622_v6 }
0x1dc8   :  { %2392 = vmatprep.subr.mxu1 %v2622_v6 }
0x1dc9   :  { %2393 = vmatpush3.msra.mxu1 %v2937_v2 }
0x1dca   :  { %2394 = vmatprep.subr.mxu1 %v2622_v6 }
0x1dcb   :  { %2395 = vmatpush3.msra.mxu1 %v2945_v11 }
0x1dcc   :  { %2396 = vmatprep.subr.mxu1 %v2622_v6 }
0x1dcd   :  { %2397 = vmatpush3.msra.mxu1 %v2952_v10 }
0x1dce   :  { %2412 = vmatprep.subr.mxu1 %v2622_v6 }
0x1e86   :  { %v1491_v27 = vpop.f32.mrf.mxu1 }
0x1e87   :  { %v1495_v28 = vadd.f32 %v1491_v27, %v1422_v26 }
0x1e88   :  { %v2378_v29 = vpop.f32.mrf.mxu1 }
0x1e89   :  { %2530 = vtanh.f32 %v1495_v28  ;;  %v2119_v31 = vmul.f32 -1.442695, %v1495_v28 }
0x1e8b   :  { %2532 = vpow2.f32 %v2119_v31 }
0x1e96   :  { %v2531_v30 = vpop.eup %2530 }
0x1e97   :  { %1505 = vrot.lane.b32.xlu0 %v2531_v30, %s2624_s26 }
0x1e98   :  { %v2533_v32 = vpop.eup %2532 }
0x1e99   :  { %v1499_v33 = vadd.f32 1.0, %v2533_v32 }
0x1e9b   :  { %2534 = vrcp.f32 %v1499_v33 }
0x1ea8   :  { %v2535_v34 = vpop.eup %2534 }
0x1ea9   :  { %v1503_v37 = vmul.f32 %v2535_v34, %v1410_v21 }
0x1f09   :  { %v1506_v35 = vpop.permute.xlu0 %1505 }
0x1f0a   :  { %v1508_v36 = vmul.f32 %v2535_v34, %v1506_v35 }
0x1f0c   :  { %1510 = vrot.lane.b32.xlu1 %v1508_v36, %s2625_s9 }
0x1f7e   :  { %v1511_v38 = vpop.permute.xlu1 %1510 }
0x1f7f   :  { %v1513_v39 = vadd.f32 %v1511_v38, %v1503_v37 }
0x1f81   :  { %2536 = vtanh.f32 %v1513_v39 }
0x1f8e   :  { %v2537_v40 = vpop.eup %2536 }
0x1f8f   :  { %1516 = vrot.lane.b32.xlu0 %v2537_v40, %s2624_s26 }
0x2001   :  { %v1517_v41 = vpop.permute.xlu0 %1516 }
0x2002   :  { %v1519_v42 = vmul.f32 %v2535_v34, %v1517_v41 }
0x2004   :  { %1521 = vrot.lane.b32.xlu1 %v1519_v42, %s2625_s9  ;;  %v1834_v42 = vld [vmem:[#allocation2 + $0xe] sm:$0x3] }
0x2076   :  { %v1522_v43 = vpop.permute.xlu1 %1521 }
0x2077   :  { %1524 = vst.msk [vmem:[#allocation3 + $0x6] sm:$0x3] %vm275_vm3, %v1522_v43  ;;  %2388 = vmatmul.mubr.msk.f32.vlgmr.msra.gmra.mxu0 %vm168_vm2, %v1522_v43 }
0x2078   :  { %2402 = vmatpush3.msra.mxu0 %v2932_v1  ;;  %2409 = vmatprep.mubr.msk.f32.mxu0 %vm2623_vm0, %v2622_v6 }
0x2079   :  { %2403 = vmatprep.subr.mxu0 %v2622_v6 }
0x207a   :  { %2404 = vmatpush3.msra.mxu0 %v2937_v2 }
0x207b   :  { %2405 = vmatprep.subr.mxu0 %v2622_v6 }
0x207c   :  { %2406 = vmatpush3.msra.mxu0 %v2945_v11 }
0x207d   :  { %2407 = vmatprep.subr.mxu0 %v2622_v6 }
0x207e   :  { %2408 = vmatpush3.msra.mxu0 %v2952_v10  ;;  %v1945_v23 = vld [vmem:[#allocation3] sm:$0xff] }
0x2137   :  { %v1594_v45 = vpop.f32.mrf.mxu0 }
0x2138   :  { %v1598_v46 = vadd.f32 %v1594_v45, %v1525_v44 }
0x2139   :  { %v2389_v47 = vpop.f32.mrf.mxu0 }
0x213a   :  { %2538 = vtanh.f32 %v1598_v46  ;;  %v2121_v49 = vmul.f32 -1.442695, %v1598_v46 }
0x213c   :  { %2540 = vpow2.f32 %v2121_v49 }
0x2147   :  { %v2539_v48 = vpop.eup %2538 }
0x2148   :  { %1608 = vrot.lane.b32.xlu0 %v2539_v48, %s2624_s26 }
0x2149   :  { %v2541_v50 = vpop.eup %2540 }
0x214a   :  { %v1602_v51 = vadd.f32 1.0, %v2541_v50 }
0x214c   :  { %2542 = vrcp.f32 %v1602_v51 }
0x2159   :  { %v2543_v52 = vpop.eup %2542 }
0x215a   :  { %v1606_v55 = vmul.f32 %v2543_v52, %v1513_v39 }
0x21ba   :  { %v1609_v53 = vpop.permute.xlu0 %1608 }
0x21bb   :  { %v1611_v54 = vmul.f32 %v2543_v52, %v1609_v53 }
0x21bd   :  { %1613 = vrot.lane.b32.xlu1 %v1611_v54, %s2625_s9 }
0x222f   :  { %v1614_v56 = vpop.permute.xlu1 %1613 }
0x2230   :  { %v1616_v57 = vadd.f32 %v1614_v56, %v1606_v55 }
0x2232   :  { %2544 = vtanh.f32 %v1616_v57 }
0x223f   :  { %v2545_v58 = vpop.eup %2544 }
0x2240   :  { %1619 = vrot.lane.b32.xlu0 %v2545_v58, %s2624_s26  ;;  %v65_v58 = vld [vmem:[%s3138_s5 + $0x10] sm:$0xff] }
0x22b2   :  { %v1620_v60 = vpop.permute.xlu0 %1619 }
0x22b3   :  { %v1622_v61 = vmul.f32 %v2543_v52, %v1620_v60  ;;  %v64_v60 = vld [vmem:[%s3138_s5 + $0x8] sm:$0xff] }
0x22b5   :  { %1624 = vrot.lane.b32.xlu1 %v1622_v61, %s2625_s9 }
0x2327   :  { %v1625_v62 = vpop.permute.xlu1 %1624 }
0x2328   :  { %1627 = vst.msk [vmem:[#allocation3 + $0x8] sm:$0x3] %vm275_vm3, %v1625_v62  ;;  %2399 = vmatmul.mubr.msk.f32.vlgmr.msra.gmra.mxu1 %vm168_vm2, %v1625_v62 }
0x2329   :  { %2413 = vmatpush3.msra.mxu1 %v2932_v1  ;;  %2420 = vmatprep.mubr.msk.f32.mxu1 %vm2623_vm0, %v2622_v6 }
0x232a   :  { %2414 = vmatprep.subr.mxu1 %v2622_v6 }
0x232b   :  { %2415 = vmatpush3.msra.mxu1 %v2937_v2 }
0x232c   :  { %2416 = vmatprep.subr.mxu1 %v2622_v6 }
0x232d   :  { %2417 = vmatpush3.msra.mxu1 %v2945_v11 }
0x232e   :  { %2418 = vmatprep.subr.mxu1 %v2622_v6 }
0x232f   :  { %2419 = vmatpush3.msra.mxu1 %v2952_v10 }
0x23e8   :  { %v1697_v0 = vpop.f32.mrf.mxu1 }
0x23e9   :  { %v1701_v4 = vadd.f32 %v1697_v0, %v1628_v63 }
0x23ea   :  { %v2400_v5 = vpop.f32.mrf.mxu1 }
0x23eb   :  { %2546 = vtanh.f32 %v1701_v4  ;;  %v2123_v15 = vmul.f32 -1.442695, %v1701_v4 }
0x23ed   :  { %2548 = vpow2.f32 %v2123_v15 }
0x23f8   :  { %v2547_v1 = vpop.eup %2546 }
0x23f9   :  { %1711 = vrot.lane.b32.xlu0 %v2547_v1, %s2624_s26 }
0x23fa   :  { %v2549_v14 = vpop.eup %2548 }
0x23fb   :  { %v1705_v2 = vadd.f32 1.0, %v2549_v14 }
0x23fd   :  { %2550 = vrcp.f32 %v1705_v2 }
0x240a   :  { %v2551_v17 = vpop.eup %2550 }
0x240b   :  { %v1709_v6 = vmul.f32 %v2551_v17, %v1616_v57  ;;  %v66_v57 = vld [vmem:[%s3138_s5 + $0x18] sm:$0xff] }
0x240c   :  { %2423 = vmatprep.subr.mxu0 %v66_v57 }
0x246b   :  { %v1712_v16 = vpop.permute.xlu0 %1711 }
0x246c   :  { %v1714_v11 = vmul.f32 %v2551_v17, %v1712_v16 }
0x246e   :  { %1716 = vrot.lane.b32.xlu1 %v1714_v11, %s2625_s9 }
0x24e0   :  { %v1717_v10 = vpop.permute.xlu1 %1716 }
0x24e1   :  { %v1719_v18 = vadd.f32 %v1717_v10, %v1709_v6 }
0x24e3   :  { %2552 = vtanh.f32 %v1719_v18 }
0x24f0   :  { %v2553_v20 = vpop.eup %2552 }
0x24f1   :  { %1722 = vrot.lane.b32.xlu0 %v2553_v20, %s2624_s26 }
0x2563   :  { %v1723_v19 = vpop.permute.xlu0 %1722 }
0x2564   :  { %v1725_v21 = vmul.f32 %v2551_v17, %v1723_v19 }
0x2566   :  { %1727 = vrot.lane.b32.xlu1 %v1725_v21, %s2625_s9 }
0x25d8   :  { %v1728_v22 = vpop.permute.xlu1 %1727 }
0x25d9   :  { %1730 = vst.msk [vmem:[#allocation3 + $0xa] sm:$0x3] %vm275_vm3, %v1728_v22  ;;  %2410 = vmatmul.mubr.msk.f32.vlgmr.msra.gmra.mxu0 %vm168_vm2, %v1728_v22 }
0x25da   :  { %2431 = vmatprep.mubr.msk.f32.mxu0 %vm168_vm2, %v1945_v23  ;;  %2424 = vmatpush3.msra.mxu0 %v66_v57 }
0x25db   :  { %2425 = vmatprep.subr.mxu0 %v65_v58 }
0x25dc   :  { %2426 = vmatpush3.msra.mxu0 %v65_v58 }
0x25dd   :  { %2427 = vmatprep.subr.mxu0 %v64_v60 }
0x25de   :  { %2428 = vmatpush3.msra.mxu0 %v64_v60 }
0x2699   :  { %v1800_v25 = vpop.f32.mrf.mxu0 }
0x269a   :  { %v1804_v26 = vadd.f32 %v1800_v25, %v1731_v24 }
0x269b   :  { %v2411_v27 = vpop.f32.mrf.mxu0 }
0x269c   :  { %2554 = vtanh.f32 %v1804_v26  ;;  %v2125_v29 = vmul.f32 -1.442695, %v1804_v26 }
0x269e   :  { %2556 = vpow2.f32 %v2125_v29 }
0x26a9   :  { %v2555_v28 = vpop.eup %2554 }
0x26aa   :  { %1814 = vrot.lane.b32.xlu0 %v2555_v28, %s2624_s26 }
0x26ab   :  { %v2557_v30 = vpop.eup %2556 }
0x26ac   :  { %v1808_v31 = vadd.f32 1.0, %v2557_v30 }
0x26ae   :  { %2558 = vrcp.f32 %v1808_v31 }
0x26bb   :  { %v2559_v32 = vpop.eup %2558 }
0x26bc   :  { %v1812_v35 = vmul.f32 %v2559_v32, %v1719_v18 }
0x271c   :  { %v1815_v33 = vpop.permute.xlu0 %1814 }
0x271d   :  { %v1817_v34 = vmul.f32 %v2559_v32, %v1815_v33 }
0x271f   :  { %1819 = vrot.lane.b32.xlu1 %v1817_v34, %s2625_s9 }
0x2791   :  { %v1820_v36 = vpop.permute.xlu1 %1819 }
0x2792   :  { %v1822_v37 = vadd.f32 %v1820_v36, %v1812_v35 }
0x2794   :  { %2560 = vtanh.f32 %v1822_v37 }
0x27a1   :  { %v2561_v38 = vpop.eup %2560 }
0x27a2   :  { %1825 = vrot.lane.b32.xlu0 %v2561_v38, %s2624_s26 }
0x2814   :  { %v1826_v39 = vpop.permute.xlu0 %1825 }
0x2815   :  { %v1828_v40 = vmul.f32 %v2559_v32, %v1826_v39 }
0x2817   :  { %1830 = vrot.lane.b32.xlu1 %v1828_v40, %s2625_s9 }
0x2889   :  { %v1831_v41 = vpop.permute.xlu1 %1830 }
0x288a   :  { %1833 = vst.msk [vmem:[#allocation3 + $0xc] sm:$0x3] %vm275_vm3, %v1831_v41  ;;  %2421 = vmatmul.mubr.msk.f32.vlgmr.msra.gmra.mxu1 %vm168_vm2, %v1831_v41 }
0x294a   :  { %v1903_v43 = vpop.f32.mrf.mxu1 }
0x294b   :  { %v1907_v44 = vadd.f32 %v1903_v43, %v1834_v42 }
0x294c   :  { %v2422_v45 = vpop.f32.mrf.mxu1 }
0x294d   :  { %2562 = vtanh.f32 %v1907_v44  ;;  %v2127_v47 = vmul.f32 -1.442695, %v1907_v44 }
0x294f   :  { %2564 = vpow2.f32 %v2127_v47 }
0x295a   :  { %v2563_v46 = vpop.eup %2562 }
0x295b   :  { %1917 = vrot.lane.b32.xlu0 %v2563_v46, %s2624_s26 }
0x295c   :  { %v2565_v48 = vpop.eup %2564 }
0x295d   :  { %v1911_v49 = vadd.f32 1.0, %v2565_v48 }
0x295f   :  { %2566 = vrcp.f32 %v1911_v49 }
0x296c   :  { %v2567_v50 = vpop.eup %2566 }
0x296d   :  { %v1915_v53 = vmul.f32 %v2567_v50, %v1822_v37 }
0x29cd   :  { %v1918_v51 = vpop.permute.xlu0 %1917 }
0x29ce   :  { %v1920_v52 = vmul.f32 %v2567_v50, %v1918_v51 }
0x29d0   :  { %1922 = vrot.lane.b32.xlu1 %v1920_v52, %s2625_s9 }
0x2a42   :  { %v1923_v54 = vpop.permute.xlu1 %1922 }
0x2a43   :  { %v1925_v55 = vadd.f32 %v1923_v54, %v1915_v53 }
0x2a45   :  { %2568 = vtanh.f32 %v1925_v55 }
0x2a52   :  { %v2569_v56 = vpop.eup %2568 }
0x2a53   :  { %1928 = vrot.lane.b32.xlu0 %v2569_v56, %s2624_s26 }
0x2a57   :  { %1000 = vrot.lane.b32.xlu0 %v2913_v59, %s2626_s11  ;;  %v63_v59 = vld [vmem:[%s3138_s5] sm:$0xff]  ;;  %s2627_s5 = smov [#allocation4]  }
0x2a58   :  { %2429 = vmatprep.subr.mxu0 %v63_v59  ;;  %s2059_s0 = sshll.u32 %s2627_s5, 4  ;;  %s2060_s0 = int_to_ptr.vmem [resolvable:$true] %s2059_s0 }
0x2a59   :  { %2430 = vmatpush3.msra.mxu0 %v63_v59  ;;  %s2578_s2 = scalar_lea.vmem %s2060_s0, 64  ;;  %p2583_p1 = scmp.lt.s32.totalorder %s2060_s0, %s2060_s0 }
0x2a5a   :  { %p2579_p0 = scmp.ne.s32.totalorder %s2060_s0, %s2578_s2  ;;  %p2584_p2 = scmp.lt.s32.totalorder %s2578_s2, %s2578_s2 }
0x2a5c   :  { %p2585_p3 = por %p2584_p2, %p2583_p1 }
0x2a5e   :  { %p2586_p4 = pnand %p2585_p3, %p2579_p0 }
0x2ac5   :  { %v1929_v61 = vpop.permute.xlu0 %1928 }
0x2ac6   :  { %v1931_v62 = vmul.f32 %v2567_v50, %v1929_v61 }
0x2ac8   :  { %1933 = vrot.lane.b32.xlu1 %v1931_v62, %s2625_s9 }
0x2ac9   :  { %v1001_v63 = vpop.permute.xlu0 %1000 }
0x2aca   :  { %1003 = vst.msk [vmem:[#allocation6] sm:$0x3] %vm275_vm3, %v1001_v63 }
0x2acc   :  { %1940 = vrot.lane.b32.xlu1 %v1925_v55, %s2626_s11 }
0x2b3a   :  { %v1934_v0 = vpop.permute.xlu1 %1933 }
0x2b3b   :  { %1936 = vst.msk [vmem:[#allocation3 + $0xe] sm:$0x3] %vm275_vm3, %v1934_v0  ;;  %1938 = vst.msk [vmem:[#allocation4 + $0x2] sm:$0x3] %vm275_vm3, %v1934_v0 }
0x2b3e   :  { %v1941_v4 = vpop.permute.xlu1 %1940 }
0x2b3f   :  { %1944 = vst.msk [vmem:[#allocation6 + $0x2] sm:$0x3] %vm275_vm3, %v1941_v4 }
0x2b42   :  { %v1946_v5 = vld [vmem:[#allocation3 + $0x8] sm:$0xff] }
0x2b43   :  { %2432 = vmatmul.mubr.msk.f32.vlgmr.msra.gmra.mxu0 %vm168_vm2, %v1946_v5 }
0x2b44   :  { %2589 = shalt.err (!%p2586_p4)
}
0x2b45   :  { %s2629_s20 = smov 2   ;;  %s2598_s22 = scalar_lea.vmem %s2072_s19, 64 }
0x2b46   :  { %2065 = dma.vmem_to_hbm [thread:$0]  %s2060_s0, 64, %s3147_s14, [#allocation5], %s2625_s9, %s2625_s9, %s2629_s20  }
0x2b47   :  { %p2599_p5 = scmp.ne.s32.totalorder %s2072_s19, %s2598_s22  ;;  %p2603_p6 = scmp.lt.s32.totalorder %s2072_s19, %s2072_s19 }
0x2b48   :  { %p2604_p7 = scmp.lt.s32.totalorder %s2598_s22, %s2598_s22 }
0x2b4a   :  { %p2605_p8 = por %p2604_p7, %p2603_p6 }
0x2b4c   :  { %p2606_p9 = pnand %p2605_p8, %p2599_p5 }
0x2b4e   :  { %2609 = shalt.err (!%p2606_p9)
}
0x2b4f   :  { %2077 = dma.vmem_to_hbm [thread:$0]  %s2072_s19, 64, %s3148_s15, [#allocation7], %s2625_s9, %s2625_s9, %s2629_s20  }
0x2b50   :  { %v2128_v1 = vld [vmem:[%s3139_s6] ss:$0 sm:$0xff] }
0x2c03   :  { %v2433_v15 = vpop.f32.mrf.mxu0 }
0x2c04   :  { %v2031_v14 = vadd.f32 %v2433_v15, %v2128_v1 }
0x2c05   :  { %v2025_v2 = vpop.f32.mrf.mxu0 }
0x2c06   :  { %v2132_v17 = vmul.f32 -1.442695, %v2031_v14  ;;  %v2026_v16 = vadd.f32 %v2128_v1, %v2025_v2 }
0x2c08   :  { %2570 = vpow2.f32 %v2132_v17  ;;  %v2131_v11 = vmul.f32 -1.442695, %v2026_v16 }
0x2c0a   :  { %2572 = vpow2.f32 %v2131_v11 }
0x2c15   :  { %v2571_v6 = vpop.eup %2570 }
0x2c16   :  { %v2041_v10 = vadd.f32 1.0, %v2571_v6 }
0x2c17   :  { %v2573_v18 = vpop.eup %2572 }
0x2c18   :  { %2574 = vrcp.f32 %v2041_v10  ;;  %v2040_v20 = vadd.f32 1.0, %v2573_v18 }
0x2c1a   :  { %2576 = vrcp.f32 %v2040_v20 }
0x2c25   :  { %v2575_v19 = vpop.eup %2574 }
0x2c26   :  { %v2047_v21 = vmul.f32 %v2575_v19, %v56_v13 }
0x2c27   :  { %v2577_v22 = vpop.eup %2576 }
0x2c28   :  { %v2049_v23 = vadd.f32 %v2047_v21, %v2751_v12  ;;  %v2046_v24 = vmul.f32 %v2577_v22, %v55_v8 }
0x2c2a   :  { %2051 = vst.msk [vmem:[%s3146_s13 + $0x8] sm:$0xff] %vm81_vm1, %v2049_v23  ;;  %v2048_v25 = vadd.f32 %v2046_v24, %v2732_v7 }
0x2c2c   :  { %2050 = vst.msk [vmem:[%s3146_s13] sm:$0xff] %vm81_vm1, %v2048_v25 }
0x2c2d   :  { %2618 = dma.done.wait [#allocation5], 64  }
0x2c2e   :  { %2619 = vsyncadd [#allocation5], 4294967232 }
0x2c2f   :  { %2620 = dma.done.wait [#allocation7], 64  }
0x2c30   :  { %2621 = vsyncadd [#allocation7], 4294967232 }
0x2c31   :  { %2086 = vsyncpa [#allocation5], 1 }
0x2c32   :  { %2087 = vsyncpa [#allocation7], 1 }

</bundles_post_ra>
